<compile_context>
chip_gen: v7x
topology: tpu7x:2x2x1
jax: 0.10.0
libtpu: 0.0.40
codegen_flags: <defaults>
</compile_context>

<pallas_src>
import jax
import jax.numpy as jnp
from jax.experimental import pallas as pl
from jax.experimental.pallas import tpu as pltpu

# Conv hyper-parameters from the PyTorch module.
CIN, COUT, KH, KW, STRIDE, PAD = 7, 12, 9, 9, 4, 4
CINP = 8                         # Cin padded 7 -> 8
KDIM = STRIDE * STRIDE * CINP    # 128 phase-channels per (row, col) tap
NQ = 3                           # column taps, folded into the contraction dim
NPH = 3                          # row taps, realized as aligned sublane slices
K2 = NQ * KDIM                   # 384-deep, lane-aligned contraction per row tap


def _make_kernel(oh, ow, b_blk):
    m = oh * ow

    def kernel(y_ref, w_ref, b_ref, o_ref):
        # y_ref: (b_blk, hp4*ow, K2)  column-expanded space-to-depth input
        # w_ref: (NPH, K2, COUT)      resident packed weights
        # b_ref: (1, COUT)            resident bias
        # o_ref: (b_blk, m, COUT)     output block (only the 12 real channels)
        bias = b_ref[...]
        for b in range(b_blk):                       # unrolled, b_blk is small
            acc = None
            for ph in range(NPH):                    # unrolled, 3 row taps
                # Aligned sublane slice: offset ph*ow is a multiple of 8 when
                # ow % 8 == 0, so no relayout copy -- streams to the MXU.
                tap = y_ref[b, ph * ow: ph * ow + m, :]
                part = jnp.dot(tap, w_ref[ph],
                               preferred_element_type=jnp.float32)
                acc = part if acc is None else acc + part   # register accumulate
            z = acc + bias
            # (z + 3).clamp(0, 6).clamp(0, 6) / 6  ==  clip(z + 3, 0, 6) * (1/6)
            o_ref[b] = (jnp.clip(z + 3.0, 0.0, 6.0) * (1.0 / 6.0)).astype(o_ref.dtype)

    return kernel


def _space_to_depth_cols(x_nchw, oh, ow):
    """(N, CIN, H, W) -> (N, (OH+2)*OW, 384).

    Row index is p*ow + mo with p in [0, OH+2); the last dim is ordered
    (q, s, r, c) so that element (n, p*ow+mo, q*128 + s*32 + r*8 + c) equals
    x_padded[n, c, 4p + s, 4(mo + q) + r]."""
    nb, cin, h, w = x_nchw.shape
    hp4, wp4 = oh + 2, ow + 2
    hp, wp = STRIDE * hp4, STRIDE * wp4
    x_p = jnp.pad(
        x_nchw,
        ((0, 0), (0, CINP - cin), (PAD, hp - h - PAD), (PAD, wp - w - PAD)),
    )
    y = x_p.reshape(nb, CINP, hp4, STRIDE, wp4, STRIDE)   # (n, c, p, s, mo, r)
    y = jnp.transpose(y, (0, 2, 4, 3, 5, 1))              # (n, p, mo, s, r, c)
    y = y.reshape(nb, hp4, wp4, KDIM)                     # inner order (s, r, c)
    # Column-tap expansion: q becomes the slowest sub-index of the last dim.
    y2 = jnp.concatenate([y[:, :, q:q + ow, :] for q in range(NQ)], axis=-1)
    return y2.reshape(nb, hp4 * ow, K2)


def _pack_weight(weight):
    """(COUT, CIN, 9, 9) -> (NPH, K2, COUT) matching the Y2 layout."""
    wpad = jnp.pad(weight, ((0, 0), (0, CINP - CIN), (0, 3), (0, 3)))
    wpad = wpad.reshape(COUT, CINP, NPH, STRIDE, NQ, STRIDE)  # (co, c, ph, s, q, r)
    wpad = jnp.transpose(wpad, (2, 4, 3, 5, 1, 0))            # (ph, q, s, r, c, co)
    return wpad.reshape(NPH, K2, COUT)


def _pick_batch_block(nb, bytes_per_img):
    """Largest divisor of nb that keeps >=2 grid steps (v7x megacore) when
    nb >= 2, is <= 8 images, and keeps the double-buffered input block small."""
    budget = 6 * 1024 * 1024
    best = 1
    for cand in range(1, min(nb, 8) + 1):
        if nb % cand:
            continue
        if nb >= 2 and nb // cand < 2:
            continue
        if cand * bytes_per_img > budget:
            continue
        best = cand
    return best


@jax.jit
def model_forward(x_nchw, weight, bias):
    nb, cin, h, w = x_nchw.shape
    assert cin == CIN
    oh = (h + 2 * PAD - KH) // STRIDE + 1
    ow = (w + 2 * PAD - KW) // STRIDE + 1
    m = oh * ow
    hp4 = oh + 2
    rows = hp4 * ow

    y2 = _space_to_depth_cols(x_nchw, oh, ow)      # (N, rows, 384)
    w_mat = _pack_weight(weight)                   # (3, 384, 12)
    b_mat = bias.reshape(1, COUT)                  # (1, 12)

    b_blk = _pick_batch_block(nb, rows * K2 * 4)
    nsteps = nb // b_blk

    out_p = pl.pallas_call(
        _make_kernel(oh, ow, b_blk),
        out_shape=jax.ShapeDtypeStruct((nb, m, COUT), jnp.float32),
        grid=(nsteps,),
        in_specs=[
            pl.BlockSpec((b_blk, rows, K2), lambda i: (i, 0, 0)),
            pl.BlockSpec((NPH, K2, COUT), lambda i: (0, 0, 0)),
            pl.BlockSpec((1, COUT), lambda i: (0, 0)),
        ],
        out_specs=pl.BlockSpec((b_blk, m, COUT), lambda i: (i, 0, 0)),
        compiler_params=pltpu.CompilerParams(
            dimension_semantics=("parallel",),
        ),
    )(y2, w_mat, b_mat)

    out = out_p.reshape(nb, oh, ow, COUT)          # only the 12 real channels
    return jnp.transpose(out, (0, 3, 1, 2))        # NCHW


def _reference(x_nchw, weight, bias):
    v1 = jax.lax.conv_general_dilated(
        x_nchw, weight,
        window_strides=(STRIDE, STRIDE),
        padding=((PAD, PAD), (PAD, PAD)),
        dimension_numbers=("NCHW", "OIHW", "NCHW"),
    ) + bias.reshape(1, COUT, 1, 1)
    return jnp.clip(v1 + 3.0, 0.0, 6.0) / 6.0


if __name__ == "__main__":
    key = jax.random.PRNGKey(0)
    kx, kw_, kb = jax.random.split(key, 3)

    # Small shapes consistent with the module: batch=2, in_channels=7, 64x64
    # spatial (OH = OW = 16, so tap slices and the flat output rows are aligned).
    x = jax.random.normal(kx, (2, CIN, 64, 64), dtype=jnp.float32)

    # Deterministic parameter init (kaiming-uniform-like bound as in torch Conv2d)
    fan_in = CIN * KH * KW
    bound = 1.0 / (fan_in ** 0.5)
    weight = jax.random.uniform(kw_, (COUT, CIN, KH, KW), jnp.float32, -bound, bound)
    bias = jax.random.uniform(kb, (COUT,), jnp.float32, -bound, bound)

    out = jax.block_until_ready(model_forward(x, weight, bias))
    ref = jax.block_until_ready(_reference(x, weight, bias))

    assert out.shape == ref.shape == (2, COUT, 16, 16)
    assert jnp.allclose(out, ref, atol=1e-4, rtol=1e-4), "mismatch vs reference"

    print("KERNEL_OK")
</pallas_src>

<mosaic_0001>
module attributes {stable_mosaic.version = 11 : i64} {
  func.func @kernel(%arg0: i32, %arg1: memref<1x288x384xf32, #tpu.memory_space<vmem>>, %arg2: memref<3x384x12xf32, #tpu.memory_space<vmem>>, %arg3: memref<1x12xf32, #tpu.memory_space<vmem>>, %arg4: memref<1x256x12xf32, #tpu.memory_space<vmem>>) attributes {dimension_semantics = [#tpu.dimension_semantics<parallel>], iteration_bounds = array<i64: 2>, scalar_prefetch = 0 : i64, scratch_operands = 0 : i64, tpu.core_type = #tpu.core_type<tc>, window_params = [{transform_indices = @transform_0, window_bounds = array<i64: 1, 288, 384>}, {pipeline_mode = #tpu.pipeline_mode<synchronous>, transform_indices = @transform_1, window_bounds = array<i64: 3, 384, 12>}, {pipeline_mode = #tpu.pipeline_mode<synchronous>, transform_indices = @transform_2, window_bounds = array<i64: 1, 12>}, {transform_indices = @transform_3, window_bounds = array<i64: 1, 256, 12>}]} {
    %c0 = arith.constant 0 : index
    %c0_0 = arith.constant 0 : index
    %0 = vector.load %arg3[%c0, %c0_0] : memref<1x12xf32, #tpu.memory_space<vmem>>, vector<1x12xf32>
    %c0_1 = arith.constant 0 : index
    %c0_2 = arith.constant 0 : index
    %c0_3 = arith.constant 0 : index
    %1 = vector.load %arg1[%c0_1, %c0_2, %c0_3] : memref<1x288x384xf32, #tpu.memory_space<vmem>>, vector<1x256x384xf32>
    %2 = vector.shape_cast %1 : vector<1x256x384xf32> to vector<256x384xf32>
    %c0_4 = arith.constant 0 : index
    %c0_5 = arith.constant 0 : index
    %c0_6 = arith.constant 0 : index
    %3 = vector.load %arg2[%c0_4, %c0_5, %c0_6] : memref<3x384x12xf32, #tpu.memory_space<vmem>>, vector<1x384x12xf32>
    %4 = vector.shape_cast %3 : vector<1x384x12xf32> to vector<384x12xf32>
    %cst = arith.constant dense<0.000000e+00> : vector<256x12xf32>
    %5 = tpu.matmul %2, %4, %cst {dimension_numbers = #tpu.dot_dimension_numbers<[1], [0], [0], [1], [0, 0, 1, 1], [], []>} : vector<256x384xf32>, vector<384x12xf32>, vector<256x12xf32> -> vector<256x12xf32>
    %c0_7 = arith.constant 0 : index
    %c16 = arith.constant 16 : index
    %c0_8 = arith.constant 0 : index
    %6 = vector.load %arg1[%c0_7, %c16, %c0_8] : memref<1x288x384xf32, #tpu.memory_space<vmem>>, vector<1x256x384xf32>
    %7 = vector.shape_cast %6 : vector<1x256x384xf32> to vector<256x384xf32>
    %c1 = arith.constant 1 : index
    %c0_9 = arith.constant 0 : index
    %c0_10 = arith.constant 0 : index
    %8 = vector.load %arg2[%c1, %c0_9, %c0_10] : memref<3x384x12xf32, #tpu.memory_space<vmem>>, vector<1x384x12xf32>
    %9 = vector.shape_cast %8 : vector<1x384x12xf32> to vector<384x12xf32>
    %cst_11 = arith.constant dense<0.000000e+00> : vector<256x12xf32>
    %10 = tpu.matmul %7, %9, %cst_11 {dimension_numbers = #tpu.dot_dimension_numbers<[1], [0], [0], [1], [0, 0, 1, 1], [], []>} : vector<256x384xf32>, vector<384x12xf32>, vector<256x12xf32> -> vector<256x12xf32>
    %11 = arith.addf %5, %10 : vector<256x12xf32>
    %c0_12 = arith.constant 0 : index
    %c32 = arith.constant 32 : index
    %c0_13 = arith.constant 0 : index
    %12 = vector.load %arg1[%c0_12, %c32, %c0_13] : memref<1x288x384xf32, #tpu.memory_space<vmem>>, vector<1x256x384xf32>
    %13 = vector.shape_cast %12 : vector<1x256x384xf32> to vector<256x384xf32>
    %c2 = arith.constant 2 : index
    %c0_14 = arith.constant 0 : index
    %c0_15 = arith.constant 0 : index
    %14 = vector.load %arg2[%c2, %c0_14, %c0_15] : memref<3x384x12xf32, #tpu.memory_space<vmem>>, vector<1x384x12xf32>
    %15 = vector.shape_cast %14 : vector<1x384x12xf32> to vector<384x12xf32>
    %cst_16 = arith.constant dense<0.000000e+00> : vector<256x12xf32>
    %16 = tpu.matmul %13, %15, %cst_16 {dimension_numbers = #tpu.dot_dimension_numbers<[1], [0], [0], [1], [0, 0, 1, 1], [], []>} : vector<256x384xf32>, vector<384x12xf32>, vector<256x12xf32> -> vector<256x12xf32>
    %17 = arith.addf %11, %16 : vector<256x12xf32>
    %18 = vector.broadcast %0 : vector<1x12xf32> to vector<256x12xf32>
    %19 = arith.addf %17, %18 : vector<256x12xf32>
    %cst_17 = arith.constant 3.000000e+00 : f32
    %20 = vector.broadcast %cst_17 : f32 to vector<256x12xf32>
    %21 = arith.addf %19, %20 : vector<256x12xf32>
    %cst_18 = arith.constant 0.000000e+00 : f32
    %cst_19 = arith.constant 6.000000e+00 : f32
    %22 = vector.broadcast %cst_18 : f32 to vector<256x12xf32>
    %23 = arith.maximumf %22, %21 : vector<256x12xf32>
    %24 = vector.broadcast %cst_19 : f32 to vector<256x12xf32>
    %25 = arith.minimumf %24, %23 : vector<256x12xf32>
    %cst_20 = arith.constant 0.166666672 : f32
    %26 = vector.broadcast %cst_20 : f32 to vector<256x12xf32>
    %27 = arith.mulf %25, %26 : vector<256x12xf32>
    %c0_21 = arith.constant 0 : index
    %c0_22 = arith.constant 0 : index
    %c0_23 = arith.constant 0 : index
    %28 = vector.load %arg4[%c0_21, %c0_22, %c0_23] : memref<1x256x12xf32, #tpu.memory_space<vmem>>, vector<1x256x12xf32>
    %29 = vector.shape_cast %28 : vector<1x256x12xf32> to vector<256x12xf32>
    %30 = vector.shape_cast %27 : vector<256x12xf32> to vector<1x256x12xf32>
    tpu.vector_store %arg4[%c0_21, %c0_22, %c0_23], %30 {strides = array<i32>} : memref<1x256x12xf32, #tpu.memory_space<vmem>>, vector<1x256x12xf32>,
    return
  }
  func.func @transform_0(%arg0: i32) -> (i32, i32, i32) {
    %c0_i32 = arith.constant 0 : i32
    %c0_i32_0 = arith.constant 0 : i32
    %c0_i32_1 = arith.constant 0 : i32
    return %arg0, %c0_i32, %c0_i32_0 : i32, i32, i32
  }
  func.func @transform_1(%arg0: i32) -> (i32, i32, i32) {
    %c0_i32 = arith.constant 0 : i32
    %c0_i32_0 = arith.constant 0 : i32
    %c0_i32_1 = arith.constant 0 : i32
    %c0_i32_2 = arith.constant 0 : i32
    return %c0_i32, %c0_i32_0, %c0_i32_1 : i32, i32, i32
  }
  func.func @transform_2(%arg0: i32) -> (i32, i32) {
    %c0_i32 = arith.constant 0 : i32
    %c0_i32_0 = arith.constant 0 : i32
    %c0_i32_1 = arith.constant 0 : i32
    return %c0_i32, %c0_i32_0 : i32, i32
  }
  func.func @transform_3(%arg0: i32) -> (i32, i32, i32) {
    %c0_i32 = arith.constant 0 : i32
    %c0_i32_0 = arith.constant 0 : i32
    %c0_i32_1 = arith.constant 0 : i32
    return %arg0, %c0_i32, %c0_i32_0 : i32, i32, i32
  }
}

</mosaic_0001>

<bundles_post_ra>
// kernel: model_forward.1
= control target key start
LH: loop header
LB: loop body
LE: loop exit
PB: predicated region body
PF: predicated region fallthrough
CT: control target
= control target key end

     0   :  { %s2924_s12 = smov 0   ;;  %s4437_s0 = inlined_call_operand.vmem [shape: f32[2,288,384], index: 0, kind: input, shape index: {}]   ;;  %s4438_s1 = inlined_call_operand.vmem [shape: f32[3,384,12], index: 1, kind: input, shape index: {}]   ;;  %s4439_s2 = inlined_call_operand.vmem [shape: f32[1,12], index: 2, kind: input, shape index: {}]   ;;  %s4440_s3 = inlined_call_operand.vmem [shape: f32[2,256,12], index: 3, kind: output, shape index: {}]  }
   0x1 LB: > { %s2152_s13 = sadd.s32 4294967295, %s2901_s12   ;;  %p2156_p0 = scmp.ge.s32.totalorder %s2901_s12, 1  ;;  %s2901_s12 = sphi %s2924_s12, %s13_s12  }
   0x2   : > { %p137_p1 = scmp.lt.s32.totalorder %s2901_s12, 3 }
   0x4   : > { %p138_p2 = pnand %p2156_p0, %p137_p1 }
   0x6   : > { %141 = sbr.rel (%p138_p2) target bundleno = 592 (0x250), region = 32 }
   0xd   : > { %v2160_v0 = vld [vmem:[%s4438_s1 + $0x180] sm:$0xff]  ;;  %v2161_v1 = vld [vmem:[%s4438_s1 + $0x188] sm:$0xff]  ;;  %p161_p3 = scmp.lt.s32.totalorder %s2152_s13, 1  ;;  %v2903_v3 = vmov 0.0|0.0   ;;  %v2162_v6 = vld [vmem:[%s4438_s1 + $0x190] sm:$0xff]  ;;  %vm2064_vm0 = vcmask 97280  }
   0xe   : > { %v2192_v2 = vld [vmem:[%s4438_s1 + $0x280] sm:$0xff]  ;;  %2644 = vmatprep.subr.bf16.mxu0 %v2903_v3  ;;  %v2645_v4 = vpack.c.bf16 %v2161_v1, %v2160_v0  ;;  %v2193_v5 = vld [vmem:[%s4438_s1 + $0x288] sm:$0xff]  ;;  %v2163_v7 = vld [vmem:[%s4438_s1 + $0x198] sm:$0xff] }
   0xf   : > { %v2692_v8 = vpack.c.bf16 %v2193_v5, %v2192_v2  ;;  %v2194_v9 = vld [vmem:[%s4438_s1 + $0x290] sm:$0xff]  ;;  %v2195_v10 = vld [vmem:[%s4438_s1 + $0x298] sm:$0xff]  ;;  %s4544_s13 = smov (!%p161_p3, %s2152_s13), 1  ;;  %v2648_v11 = vpack.c.bf16 %v2163_v7, %v2162_v6  ;;  %v2196_v13 = vld [vmem:[%s4438_s1 + $0x2a0] sm:$0xff] }
  0x10   : > { %2646 = vmatpush1.bf16.msra.mxu0 %v2645_v4  ;;  %v2696_v12 = vpack.c.bf16 %v2195_v10, %v2194_v9  ;;  %v2197_v14 = vld [vmem:[%s4438_s1 + $0x2a8] sm:$0xff]  ;;  %v2164_v15 = vld [vmem:[%s4438_s1 + $0x1a0] sm:$0xff]  ;;  %s2884_s11 = smul.u32 864, %s4544_s13  ;;  %v2198_v19 = vld [vmem:[%s4438_s1 + $0x2b0] sm:$0xff]  ;;  %s2259_s17 = sshll.u32 %s4544_s13, 8 }
  0x11   : > { %2693 = vmatprep.subr.bf16.mxu1 %v2692_v8  ;;  %2647 = vmatprep.subr.bf16.mxu0 %v2903_v3  ;;  %v2165_v16 = vld [vmem:[%s4438_s1 + $0x1a8] sm:$0xff]  ;;  %v2700_v17 = vpack.c.bf16 %v2197_v14, %v2196_v13  ;;  %v2199_v20 = vld [vmem:[%s4438_s1 + $0x2b8] sm:$0xff]  ;;  %v2166_v21 = vld [vmem:[%s4438_s1 + $0x1b0] sm:$0xff]  ;;  %s4294_s21 = scalar_lea.vmem %s4440_s3, %s2259_s17 }
  0x12   : > { %2695 = vmatpush3.bf16.msra.mxu1 %v2692_v8  ;;  %v2651_v18 = vpack.c.bf16 %v2165_v16, %v2164_v15  ;;  %s2982_s20 = scalar_lea.vmem %s4437_s0, %s2884_s11  ;;  %v2167_v22 = vld [vmem:[%s4438_s1 + $0x1b8] sm:$0xff]  ;;  %v2704_v23 = vpack.c.bf16 %v2199_v20, %v2198_v19  ;;  %v2200_v26 = vld [vmem:[%s4438_s1 + $0x2c0] sm:$0xff]  ;;  %v2201_v27 = vld [vmem:[%s4438_s1 + $0x2c8] sm:$0xff] }
  0x13   : > { %2697 = vmatprep.subr.bf16.mxu1 %v2696_v12  ;;  %v180_v24 = vld [vmem:[%s2982_s20 + $0x40] sm:$0xff]  ;;  %v2654_v25 = vpack.c.bf16 %v2167_v22, %v2166_v21  ;;  %v2169_v29 = vld [vmem:[%s4438_s1 + $0x1c8] sm:$0xff]  ;;  %v2708_v30 = vpack.c.bf16 %v2201_v27, %v2200_v26  ;;  %v2202_v32 = vld [vmem:[%s4438_s1 + $0x2d0] sm:$0xff] }
  0x14   : > { %2649 = vmatpush1.bf16.msra.mxu0 %v2648_v11  ;;  %2436 = vmatprep.mubr.f32.mxu1 %v180_v24  ;;  %v2168_v28 = vld [vmem:[%s4438_s1 + $0x1c0] sm:$0xff]  ;;  %v2203_v33 = vld [vmem:[%s4438_s1 + $0x2d8] sm:$0xff]  ;;  %v2170_v34 = vld [vmem:[%s4438_s1 + $0x1d0] sm:$0xff] }
  0x15   : > { %2650 = vmatprep.subr.bf16.mxu0 %v2903_v3  ;;  %v2657_v31 = vpack.c.bf16 %v2169_v29, %v2168_v28  ;;  %v2171_v35 = vld [vmem:[%s4438_s1 + $0x1d8] sm:$0xff]  ;;  %v2712_v36 = vpack.c.bf16 %v2203_v33, %v2202_v32  ;;  %v2204_v38 = vld [vmem:[%s4438_s1 + $0x2e0] sm:$0xff]  ;;  %v2205_v39 = vld [vmem:[%s4438_s1 + $0x2e8] sm:$0xff] }
  0x16   : > { %2699 = vmatpush3.bf16.msra.mxu1 %v2696_v12  ;;  %v2660_v37 = vpack.c.bf16 %v2171_v35, %v2170_v34  ;;  %v2172_v40 = vld [vmem:[%s4438_s1 + $0x1e0] sm:$0xff]  ;;  %v2173_v41 = vld [vmem:[%s4438_s1 + $0x1e8] sm:$0xff]  ;;  %v2716_v42 = vpack.c.bf16 %v2205_v39, %v2204_v38  ;;  %v2206_v44 = vld [vmem:[%s4438_s1 + $0x2f0] sm:$0xff] }
  0x17   : > { %2701 = vmatprep.subr.bf16.mxu1 %v2700_v17  ;;  %v2663_v43 = vpack.c.bf16 %v2173_v41, %v2172_v40  ;;  %v2207_v45 = vld [vmem:[%s4438_s1 + $0x2f8] sm:$0xff]  ;;  %v2174_v46 = vld [vmem:[%s4438_s1 + $0x1f0] sm:$0xff]  ;;  %v2176_v51 = vld [vmem:[%s4438_s1 + $0x200] sm:$0xff] }
  0x18   : > { %2652 = vmatpush1.bf16.msra.mxu0 %v2651_v18  ;;  %v2175_v47 = vld [vmem:[%s4438_s1 + $0x1f8] sm:$0xff]  ;;  %v2720_v48 = vpack.c.bf16 %v2207_v45, %v2206_v44  ;;  %v2177_v52 = vld [vmem:[%s4438_s1 + $0x208] sm:$0xff]  ;;  %v268_v53 = vld [vmem:[%s4438_s1] sm:$0xff] }
  0x19   : > { %2653 = vmatprep.subr.bf16.mxu0 %v2903_v3  ;;  %v3045_v49 = vld [vmem:[%s2982_s20 + $0x38] sm:$0xff]  ;;  %v2666_v50 = vpack.c.bf16 %v2175_v47, %v2174_v46  ;;  %v269_v54 = vld [vmem:[%s4438_s1 + $0x8] sm:$0xff]  ;;  %v2669_v55 = vpack.c.bf16 %v2177_v52, %v2176_v51  ;;  %v2178_v56 = vld [vmem:[%s4438_s1 + $0x210] sm:$0xff] }
  0x1a   : > { %2703 = vmatpush3.bf16.msra.mxu1 %v2700_v17  ;;  %435 = vmatprep.mubr.f32.mxu0 %v3045_v49  ;;  %v2179_v57 = vld [vmem:[%s4438_s1 + $0x218] sm:$0xff]  ;;  %v2725_v59 = vpack.c.bf16 %v269_v54, %v268_v53  ;;  %v3073_v60 = vld [vmem:[%s2982_s20 + $0x70] sm:$0xff]  ;;  %v2180_v0 = vld [vmem:[%s4438_s1 + $0x220] sm:$0xff] }
  0x1b   : > { %2705 = vmatprep.subr.bf16.mxu1 %v2704_v23  ;;  %v3069_v58 = vld [vmem:[%s2982_s20 + $0x58] sm:$0xff]  ;;  %v270_v61 = vld [vmem:[%s4438_s1 + $0x10] sm:$0xff]  ;;  %v2672_v63 = vpack.c.bf16 %v2179_v57, %v2178_v56  ;;  %v2181_v1 = vld [vmem:[%s4438_s1 + $0x228] sm:$0xff] }
  0x1c   : > { %2655 = vmatpush1.bf16.msra.mxu0 %v2654_v25  ;;  %v271_v62 = vld [vmem:[%s4438_s1 + $0x18] sm:$0xff]  ;;  %v3091_v2 = vld [vmem:[%s2982_s20 + $0x88] sm:$0xff]  ;;  %v3095_v5 = vld [vmem:[%s2982_s20 + $0xa0] sm:$0xff]  ;;  %v2675_v8 = vpack.c.bf16 %v2181_v1, %v2180_v0 }
  0x1d   : > { %2656 = vmatprep.subr.bf16.mxu0 %v2903_v3  ;;  %v2728_v4 = vpack.c.bf16 %v271_v62, %v270_v61  ;;  %v272_v6 = vld [vmem:[%s4438_s1 + $0x20] sm:$0xff]  ;;  %v273_v7 = vld [vmem:[%s4438_s1 + $0x28] sm:$0xff]  ;;  %v2182_v9 = vld [vmem:[%s4438_s1 + $0x230] sm:$0xff] }
  0x1e   : > { %2707 = vmatpush3.bf16.msra.mxu1 %v2704_v23  ;;  %v2183_v10 = vld [vmem:[%s4438_s1 + $0x238] sm:$0xff]  ;;  %v2731_v12 = vpack.c.bf16 %v273_v7, %v272_v6  ;;  %v3117_v13 = vld [vmem:[%s2982_s20 + $0xd0] sm:$0xff]  ;;  %v2184_v17 = vld [vmem:[%s4438_s1 + $0x240] sm:$0xff] }
  0x1f   : > { %2709 = vmatprep.subr.bf16.mxu1 %v2708_v30  ;;  %v3113_v11 = vld [vmem:[%s2982_s20 + $0xb8] sm:$0xff]  ;;  %v274_v14 = vld [vmem:[%s4438_s1 + $0x30] sm:$0xff]  ;;  %v2678_v16 = vpack.c.bf16 %v2183_v10, %v2182_v9  ;;  %v2185_v18 = vld [vmem:[%s4438_s1 + $0x248] sm:$0xff] }
  0x20   : > { %2658 = vmatpush1.bf16.msra.mxu0 %v2657_v31  ;;  %v275_v15 = vld [vmem:[%s4438_s1 + $0x38] sm:$0xff]  ;;  %v3135_v19 = vld [vmem:[%s2982_s20 + $0xe8] sm:$0xff]  ;;  %v3139_v21 = vld [vmem:[%s2982_s20 + $0x100] sm:$0xff]  ;;  %v2681_v24 = vpack.c.bf16 %v2185_v18, %v2184_v17 }
  0x21   : > { %2659 = vmatprep.subr.bf16.mxu0 %v2903_v3  ;;  %v2734_v20 = vpack.c.bf16 %v275_v15, %v274_v14  ;;  %v276_v22 = vld [vmem:[%s4438_s1 + $0x40] sm:$0xff]  ;;  %v277_v23 = vld [vmem:[%s4438_s1 + $0x48] sm:$0xff]  ;;  %v2186_v25 = vld [vmem:[%s4438_s1 + $0x250] sm:$0xff] }
  0x22   : > { %2711 = vmatpush3.bf16.msra.mxu1 %v2708_v30  ;;  %v2187_v26 = vld [vmem:[%s4438_s1 + $0x258] sm:$0xff]  ;;  %v2737_v28 = vpack.c.bf16 %v277_v23, %v276_v22  ;;  %v3161_v29 = vld [vmem:[%s2982_s20 + $0x130] sm:$0xff]  ;;  %v2188_v33 = vld [vmem:[%s4438_s1 + $0x260] sm:$0xff] }
  0x23   : > { %2713 = vmatprep.subr.bf16.mxu1 %v2712_v36  ;;  %v3157_v27 = vld [vmem:[%s2982_s20 + $0x118] sm:$0xff]  ;;  %v278_v30 = vld [vmem:[%s4438_s1 + $0x50] sm:$0xff]  ;;  %v2684_v32 = vpack.c.bf16 %v2187_v26, %v2186_v25  ;;  %v2189_v34 = vld [vmem:[%s4438_s1 + $0x268] sm:$0xff] }
  0x24   : > { %2661 = vmatpush1.bf16.msra.mxu0 %v2660_v37  ;;  %v279_v31 = vld [vmem:[%s4438_s1 + $0x58] sm:$0xff]  ;;  %v3179_v35 = vld [vmem:[%s2982_s20 + $0x148] sm:$0xff]  ;;  %v3183_v37 = vld [vmem:[%s2982_s20 + $0x160] sm:$0xff]  ;;  %v2687_v40 = vpack.c.bf16 %v2189_v34, %v2188_v33 }
  0x25   : > { %2662 = vmatprep.subr.bf16.mxu0 %v2903_v3  ;;  %v280_v38 = vld [vmem:[%s4438_s1 + $0x60] sm:$0xff]  ;;  %v281_v39 = vld [vmem:[%s4438_s1 + $0x68] sm:$0xff]  ;;  %v2190_v41 = vld [vmem:[%s4438_s1 + $0x270] sm:$0xff] }
  0x26   : > { %2715 = vmatpush3.bf16.msra.mxu1 %v2712_v36  ;;  %v2740_v36 = vpack.c.bf16 %v279_v31, %v278_v30  ;;  %v2743_v44 = vpack.c.bf16 %v281_v39, %v280_v38  ;;  %v300_v45 = vld [vmem:[%s4438_s1 + $0x100] sm:$0xff]  ;;  %v301_v46 = vld [vmem:[%s4438_s1 + $0x108] sm:$0xff]  ;;  %v3211_v47 = vld [vmem:[%s2982_s20 + $0x190] sm:$0xff] }
  0x27   : > { %2717 = vmatprep.subr.bf16.mxu1 %v2716_v42  ;;  %v2772_v52 = vpack.c.bf16 %v301_v46, %v300_v45  ;;  %v3223_v53 = vld [vmem:[%s2982_s20 + $0x1a8] sm:$0xff]  ;;  %v303_v56 = vld [vmem:[%s4438_s1 + $0x118] sm:$0xff]  ;;  %v3233_v57 = vld [vmem:[%s2982_s20 + $0x1c0] sm:$0xff] }
  0x28   : > { %2664 = vmatpush1.bf16.msra.mxu0 %v2663_v43  ;;  %v3201_v43 = vld [vmem:[%s2982_s20 + $0x178] sm:$0xff]  ;;  %v285_v61 = vld [vmem:[%s4438_s1 + $0x88] sm:$0xff]  ;;  %v3242_v62 = vld [vmem:[%s2982_s20 + $0x30] sm:$0xff] }
  0x29   : > { %2665 = vmatprep.subr.bf16.mxu0 %v2903_v3  ;;  %v3250_v1 = vld [vmem:[%s2982_s20 + $0x1d8] sm:$0xff]  ;;  %v304_v6 = vld [vmem:[%s4438_s1 + $0x120] sm:$0xff]  ;;  %v305_v7 = vld [vmem:[%s4438_s1 + $0x128] sm:$0xff] }
  0x2a   : > { %2719 = vmatpush3.bf16.msra.mxu1 %v2716_v42  ;;  %v2191_v42 = vld [vmem:[%s4438_s1 + $0x278] sm:$0xff]  ;;  %v286_v9 = vld [vmem:[%s4438_s1 + $0x90] sm:$0xff]  ;;  %v3275_v14 = vld [vmem:[%s2982_s20 + $0x68] sm:$0xff]  ;;  %v2780_v15 = vpack.c.bf16 %v305_v7, %v304_v6 }
  0x2b   : > { %2721 = vmatprep.subr.bf16.mxu1 %v2720_v48  ;;  %v2690_v51 = vpack.c.bf16 %v2191_v42, %v2190_v41  ;;  %v287_v10 = vld [vmem:[%s4438_s1 + $0x98] sm:$0xff]  ;;  %v306_v18 = vld [vmem:[%s4438_s1 + $0x130] sm:$0xff]  ;;  %v3290_v22 = vld [vmem:[%s2982_s20 + $0x220] sm:$0xff] }
  0x2c   : > { %2667 = vmatpush1.bf16.msra.mxu0 %v2666_v50  ;;  %v283_v50 = vld [vmem:[%s4438_s1 + $0x78] sm:$0xff]  ;;  %v2752_v17 = vpack.c.bf16 %v287_v10, %v286_v9  ;;  %v288_v23 = vld [vmem:[%s4438_s1 + $0xa0] sm:$0xff]  ;;  %v309_v33 = vld [vmem:[%s4438_s1 + $0x148] sm:$0xff] }
  0x2d   : > { %2668 = vmatprep.subr.bf16.mxu0 %v2903_v3  ;;  %v3300_v25 = vld [vmem:[%s2982_s20 + $0x60] sm:$0xff]  ;;  %v3308_v30 = vld [vmem:[%s2982_s20 + $0x238] sm:$0xff]  ;;  %v3319_v34 = vld [vmem:[%s2982_s20 + $0x250] sm:$0xff] }
  0x2e   : > { %2723 = vmatpush3.bf16.msra.mxu1 %v2720_v48  ;;  %v282_v48 = vld [vmem:[%s4438_s1 + $0x70] sm:$0xff]  ;;  %v3304_v26 = vld [vmem:[%s2982_s20 + $0x80] sm:$0xff]  ;;  %v291_v38 = vld [vmem:[%s4438_s1 + $0xb8] sm:$0xff] }
  0x2f   : > { %2724 = vmatprep.subr.bf16.mxu1 %v2903_v3  ;;  %v2746_v54 = vpack.c.bf16 %v283_v50, %v282_v48  ;;  %v3329_v39 = vld [vmem:[%s2982_s20 + $0x78] sm:$0xff]  ;;  %v3337_v42 = vld [vmem:[%s2982_s20 + $0x268] sm:$0xff]  ;;  %v310_v45 = vld [vmem:[%s4438_s1 + $0x150] sm:$0xff] }
  0x30   : > { %2670 = vmatpush1.bf16.msra.mxu0 %v2669_v55  ;;  %v302_v55 = vld [vmem:[%s4438_s1 + $0x110] sm:$0xff]  ;;  %v311_v46 = vld [vmem:[%s4438_s1 + $0x158] sm:$0xff]  ;;  %v3348_v48 = vld [vmem:[%s2982_s20 + $0x280] sm:$0xff] }
  0x31   : > { %2437 = vmatmul.mubr.f32.vlgmr.msra.gmra.mrb[0].mxu1 %v3069_v58  ;;  %2671 = vmatprep.subr.bf16.mxu0 %v2903_v3  ;;  %v2776_v0 = vpack.c.bf16 %v303_v56, %v302_v55  ;;  %4475 = vst [vmem:[#allocation2_spill] sm:$0xff] %v3348_v48  ;;  %v292_v50 = vld [vmem:[%s4438_s1 + $0xc0] sm:$0xff]  ;;  %v2792_v55 = vpack.c.bf16 %v311_v46, %v310_v45  ;;  %v3366_v56 = vld [vmem:[%s2982_s20 + $0x298] sm:$0xff]  ;;  %v294_v6 = vld [vmem:[%s4438_s1 + $0xd0] sm:$0xff] }
  0x32   : > { %2726 = vmatpush1.bf16.msra.mxu1 %v2725_v59  ;;  %2439 = vmatprep.mubr.f32.mxu1 %v3073_v60  ;;  %v284_v59 = vld [vmem:[%s4438_s1 + $0x80] sm:$0xff]  ;;  %4476 = vst [vmem:[#allocation3_spill] sm:$0xff] %v3366_v56  ;;  %v295_v7 = vld [vmem:[%s4438_s1 + $0xd8] sm:$0xff]  ;;  %v3387_v9 = vld [vmem:[%s2982_s20 + $0xa8] sm:$0xff] }
  0x33   : > { %2727 = vmatprep.subr.bf16.mxu1 %v2903_v3  ;;  %v3391_v10 = vld [vmem:[%s2982_s20 + $0xc8] sm:$0xff]  ;;  %v298_v45 = vld [vmem:[%s4438_s1 + $0xf0] sm:$0xff]  ;;  %v299_v46 = vld [vmem:[%s4438_s1 + $0xf8] sm:$0xff] }
  0x34   : > { %2673 = vmatpush1.bf16.msra.mxu0 %v2672_v63  ;;  %v3246_v63 = vld [vmem:[%s2982_s20 + $0x50] sm:$0xff] }
  0x35   : > { %2440 = vmatmul.mubr.f32.gmra.mrb[2].mxu1 %v3091_v2  ;;  %2674 = vmatprep.subr.bf16.mxu0 %v2903_v3 }
  0x36   : > { %2729 = vmatpush1.bf16.msra.mxu1 %v2728_v4  ;;  %2442 = vmatprep.mubr.f32.mxu1 %v3095_v5  ;;  %v2749_v4 = vpack.c.bf16 %v285_v61, %v284_v59  ;;  %v312_v61 = vld [vmem:[%s4438_s1 + $0x160] sm:$0xff] }
  0x37   : > { %2730 = vmatprep.subr.bf16.mxu1 %v2903_v3 }
  0x38   : > { %2676 = vmatpush1.bf16.msra.mxu0 %v2675_v8  ;;  %v3261_v8 = vld [vmem:[%s2982_s20 + $0x1f0] sm:$0xff] }
  0x39   : > { %2443 = vmatmul.mubr.f32.gmra.mrb[4].mxu1 %v3113_v11  ;;  %2677 = vmatprep.subr.bf16.mxu0 %v2903_v3 }
  0x3a   : > { %2732 = vmatpush1.bf16.msra.mxu1 %v2731_v12  ;;  %2445 = vmatprep.mubr.f32.mxu1 %v3117_v13  ;;  %v3271_v12 = vld [vmem:[%s2982_s20 + $0x48] sm:$0xff] }
  0x3b   : > { %2733 = vmatprep.subr.bf16.mxu1 %v2903_v3 }
  0x3c   : > { %2679 = vmatpush1.bf16.msra.mxu0 %v2678_v16  ;;  %v3279_v16 = vld [vmem:[%s2982_s20 + $0x208] sm:$0xff] }
  0x3d   : > { %2446 = vmatmul.mubr.f32.gmra.mrb[6].mxu1 %v3135_v19  ;;  %2680 = vmatprep.subr.bf16.mxu0 %v2903_v3 }
  0x3e   : > { %2735 = vmatpush1.bf16.msra.mxu1 %v2734_v20  ;;  %2448 = vmatprep.mubr.f32.mxu1 %v3139_v21  ;;  %v307_v20 = vld [vmem:[%s4438_s1 + $0x138] sm:$0xff] }
  0x3f   : > { %2736 = vmatprep.subr.bf16.mxu1 %v2903_v3 }
  0x40   : > { %2682 = vmatpush1.bf16.msra.mxu0 %v2681_v24  ;;  %v289_v24 = vld [vmem:[%s4438_s1 + $0xa8] sm:$0xff] }
  0x41   : > { %2449 = vmatmul.mubr.f32.gmra.mrb[8].mxu1 %v3157_v27  ;;  %2683 = vmatprep.subr.bf16.mxu0 %v2903_v3  ;;  %v2755_v31 = vpack.c.bf16 %v289_v24, %v288_v23  ;;  %v315_v23 = vld [vmem:[%s4438_s1 + $0x178] sm:$0xff]  ;;  %v3406_v24 = vld [vmem:[%s2982_s20 + $0x2e0] sm:$0xff] }
  0x42   : > { %2738 = vmatpush1.bf16.msra.mxu1 %v2737_v28  ;;  %2451 = vmatprep.mubr.f32.mxu1 %v3161_v29  ;;  %v2784_v28 = vpack.c.bf16 %v307_v20, %v306_v18  ;;  %v2764_v18 = vpack.c.bf16 %v295_v7, %v294_v6  ;;  %v314_v20 = vld [vmem:[%s4438_s1 + $0x170] sm:$0xff]  ;;  %4479 = vst [vmem:[#allocation6_spill] sm:$0xff] %v3406_v24  ;;  %v2209_v6 = vld [vmem:[%s4438_s1 + $0x308] sm:$0xff] }
  0x43   : > { %2739 = vmatprep.subr.bf16.mxu1 %v2903_v3  ;;  %v3455_v7 = vld [vmem:[%s2982_s20 + $0xf0] sm:$0xff] }
  0x44   : > { %2685 = vmatpush1.bf16.msra.mxu0 %v2684_v32  ;;  %v308_v32 = vld [vmem:[%s4438_s1 + $0x140] sm:$0xff]  ;;  %4485 = vst [vmem:[#allocation12_spill] sm:$0xff] %v3455_v7 }
  0x45   : > { %2452 = vmatmul.mubr.f32.gmra.mrb[10].mxu1 %v3179_v35  ;;  %2686 = vmatprep.subr.bf16.mxu0 %v2903_v3  ;;  %v2788_v41 = vpack.c.bf16 %v309_v33, %v308_v32  ;;  %v3416_v32 = vld [vmem:[%s2982_s20 + $0xc0] sm:$0xff] }
  0x46   : > { %2741 = vmatpush1.bf16.msra.mxu1 %v2740_v36  ;;  %2454 = vmatprep.mubr.f32.mxu1 %v3183_v37  ;;  %v290_v36 = vld [vmem:[%s4438_s1 + $0xb0] sm:$0xff]  ;;  %4480 = vst [vmem:[#allocation7_spill] sm:$0xff] %v3416_v32  ;;  %v3420_v33 = vld [vmem:[%s2982_s20 + $0xe0] sm:$0xff] }
  0x47   : > { %2742 = vmatprep.subr.bf16.mxu1 %v2903_v3  ;;  %4481 = vst [vmem:[#allocation8_spill] sm:$0xff] %v3420_v33 }
  0x48   : > { %2688 = vmatpush1.bf16.msra.mxu0 %v2687_v40  ;;  %v3333_v40 = vld [vmem:[%s2982_s20 + $0x98] sm:$0xff] }
  0x49   : > { %2455 = vmatmul.mubr.f32.gmra.mrb[12].mxu1 %v3201_v43  ;;  %2689 = vmatprep.subr.bf16.mxu0 %v2903_v3 }
  0x4a   : > { %2744 = vmatpush1.bf16.msra.mxu1 %v2743_v44  ;;  %2457 = vmatprep.mubr.f32.mxu1 %v3211_v47  ;;  %v2758_v44 = vpack.c.bf16 %v291_v38, %v290_v36  ;;  %v2800_v36 = vpack.c.bf16 %v315_v23, %v314_v20  ;;  %v3424_v38 = vld [vmem:[%s2982_s20 + $0x2f8] sm:$0xff]  ;;  %v2241_v20 = vld [vmem:[%s4438_s1 + $0x408] sm:$0xff]  ;;  %v172_v23 = vld [vmem:[%s2982_s20] sm:$0xff] }
  0x4b   : > { %2745 = vmatprep.subr.bf16.mxu1 %v2903_v3  ;;  %4482 = vst [vmem:[#allocation9_spill] sm:$0xff] %v3424_v38 }
  0x4c   : > { %2691 = vmatpush1.bf16.msra.mxu0 %v2690_v51  ;;  %v293_v51 = vld [vmem:[%s4438_s1 + $0xc8] sm:$0xff] }
  0x4d   : > { %2458 = vmatmul.mubr.f32.gmra.mrb[14].mxu1 %v3223_v53  ;;  %2773 = vmatprep.subr.bf16.mxu0 %v2772_v52  ;;  %v2761_v59 = vpack.c.bf16 %v293_v51, %v292_v50  ;;  %v3437_v50 = vld [vmem:[%s2982_s20 + $0xd8] sm:$0xff] }
  0x4e   : > { %2747 = vmatpush1.bf16.msra.mxu1 %v2746_v54  ;;  %2460 = vmatprep.mubr.f32.mxu1 %v3233_v57  ;;  %v3362_v54 = vld [vmem:[%s2982_s20 + $0xb0] sm:$0xff]  ;;  %4483 = vst [vmem:[#allocation10_spill] sm:$0xff] %v3437_v50  ;;  %v3441_v51 = vld [vmem:[%s2982_s20 + $0xf8] sm:$0xff] }
  0x4f   : > { %436 = vmatmul.mubr.f32.vlgmr.msra.gmra.mrb[0].mxu0 %v3242_v62  ;;  %2748 = vmatprep.subr.bf16.mxu1 %v2903_v3  ;;  %4484 = vst [vmem:[#allocation11_spill] sm:$0xff] %v3441_v51 }
  0x50   : > { %440 = vmatprep.mubr.f32.mxu0 %v3246_v63  ;;  %2775 = vmatpush3.bf16.msra.mxu0 %v2772_v52  ;;  %v3358_v52 = vld [vmem:[%s2982_s20 + $0x90] sm:$0xff] }
  0x51   : > { %2461 = vmatmul.mubr.f32.gmra.mrb[16].mxu1 %v3250_v1  ;;  %2777 = vmatprep.subr.bf16.mxu0 %v2776_v0 }
  0x52   : > { %2750 = vmatpush1.bf16.msra.mxu1 %v2749_v4  ;;  %2463 = vmatprep.mubr.f32.mxu1 %v3261_v8  ;;  %v3377_v4 = vld [vmem:[%s2982_s20 + $0x2b0] sm:$0xff] }
  0x53   : > { %441 = vmatmul.mubr.f32.gmra.mrb[2].mxu0 %v3271_v12  ;;  %2751 = vmatprep.subr.bf16.mxu1 %v2903_v3  ;;  %4477 = vst [vmem:[#allocation4_spill] sm:$0xff] %v3377_v4 }
  0x54   : > { %445 = vmatprep.mubr.f32.mxu0 %v3275_v14  ;;  %2779 = vmatpush3.bf16.msra.mxu0 %v2776_v0  ;;  %v313_v0 = vld [vmem:[%s4438_s1 + $0x168] sm:$0xff] }
  0x55   : > { %2464 = vmatmul.mubr.f32.gmra.mrb[18].mxu1 %v3279_v16  ;;  %2781 = vmatprep.subr.bf16.mxu0 %v2780_v15 }
  0x56   : > { %2753 = vmatpush1.bf16.msra.mxu1 %v2752_v17  ;;  %2466 = vmatprep.mubr.f32.mxu1 %v3290_v22  ;;  %v3395_v17 = vld [vmem:[%s2982_s20 + $0x2c8] sm:$0xff] }
  0x57   : > { %446 = vmatmul.mubr.f32.gmra.mrb[4].mxu0 %v3300_v25  ;;  %2754 = vmatprep.subr.bf16.mxu1 %v2903_v3  ;;  %4478 = vst [vmem:[#allocation5_spill] sm:$0xff] %v3395_v17 }
  0x58   : > { %450 = vmatprep.mubr.f32.mxu0 %v3304_v26  ;;  %2783 = vmatpush3.bf16.msra.mxu0 %v2780_v15  ;;  %v2796_v15 = vpack.c.bf16 %v313_v0, %v312_v61  ;;  %v173_v61 = vld [vmem:[%s2982_s20 + $0x8] sm:$0xff]  ;;  %v2208_v0 = vld [vmem:[%s4438_s1 + $0x300] sm:$0xff] }
  0x59   : > { %2467 = vmatmul.mubr.f32.gmra.mrb[20].mxu1 %v3308_v30  ;;  %2785 = vmatprep.subr.bf16.mxu0 %v2784_v28 }
  0x5a   : > { %2756 = vmatpush1.bf16.msra.mxu1 %v2755_v31  ;;  %2469 = vmatprep.mubr.f32.mxu1 %v3319_v34  ;;  %v297_v31 = vld [vmem:[%s4438_s1 + $0xe8] sm:$0xff] }
  0x5b   : > { %451 = vmatmul.mubr.f32.gmra.mrb[6].mxu0 %v3329_v39  ;;  %2757 = vmatprep.subr.bf16.mxu1 %v2903_v3 }
  0x5c   : > { %455 = vmatprep.mubr.f32.mxu0 %v3333_v40  ;;  %2787 = vmatpush3.bf16.msra.mxu0 %v2784_v28  ;;  %v296_v28 = vld [vmem:[%s4438_s1 + $0xe0] sm:$0xff] }
  0x5d   : > { %2470 = vmatmul.mubr.f32.gmra.mrb[22].mxu1 %v3337_v42  ;;  %2789 = vmatprep.subr.bf16.mxu0 %v2788_v41 }
  0x5e   : > { %2759 = vmatpush1.bf16.msra.mxu1 %v2758_v44  ;;  %2472 = vmatprep.mubr.f32.mxu1 %v3348_v48  ;;  %v318_v44 = vld [vmem:[%s2982_s20 + $0x310] sm:$0xff]  ;;  %v3632_v48 = vld [vmem:[%s2982_s20 + $0x1e0] sm:$0xff] }
  0x5f   : > { %456 = vmatmul.mubr.f32.gmra.mrb[8].mxu0 %v3358_v52  ;;  %2760 = vmatprep.subr.bf16.mxu1 %v2903_v3  ;;  %4500 = vst [vmem:[#allocation27_spill] sm:$0xff] %v3632_v48 }
  0x60   : > { %460 = vmatprep.mubr.f32.mxu0 %v3362_v54  ;;  %2791 = vmatpush3.bf16.msra.mxu0 %v2788_v41  ;;  %v2767_v41 = vpack.c.bf16 %v297_v31, %v296_v28  ;;  %v2805_v28 = vpack.c.bf16 %v2209_v6, %v2208_v0  ;;  %v2213_v0 = vld [vmem:[%s4438_s1 + $0x328] sm:$0xff]  ;;  %v3497_v6 = vld [vmem:[%s2982_s20 + $0x120] sm:$0xff] }
  0x61   : > { %2473 = vmatmul.mubr.f32.gmra.mrb[24].mxu1 %v3366_v56  ;;  %2793 = vmatprep.subr.bf16.mxu0 %v2792_v55  ;;  %4489 = vst [vmem:[#allocation16_spill] sm:$0xff] %v3497_v6  ;;  %v3615_v56 = vld [vmem:[%s2982_s20 + $0x1c8] sm:$0xff] }
  0x62   : > { %2762 = vmatpush1.bf16.msra.mxu1 %v2761_v59  ;;  %2475 = vmatprep.mubr.f32.mxu1 %v3377_v4  ;;  %v2770_v59 = vpack.c.bf16 %v299_v46, %v298_v45  ;;  %v3480_v45 = vld [vmem:[%s2982_s20 + $0x108] sm:$0xff]  ;;  %v2227_v4 = vld [vmem:[%s4438_s1 + $0x398] sm:$0xff]  ;;  %4498 = vst [vmem:[#allocation25_spill] sm:$0xff] %v3615_v56 }
  0x63   : > { %461 = vmatmul.mubr.f32.gmra.mrb[10].mxu0 %v3387_v9  ;;  %2763 = vmatprep.subr.bf16.mxu1 %v2903_v3  ;;  %4487 = vst [vmem:[#allocation14_spill] sm:$0xff] %v3480_v45  ;;  %v3484_v46 = vld [vmem:[%s2982_s20 + $0x128] sm:$0xff] }
  0x64   : > { %465 = vmatprep.mubr.f32.mxu0 %v3391_v10  ;;  %2795 = vmatpush3.bf16.msra.mxu0 %v2792_v55  ;;  %v321_v55 = vld [vmem:[%s2982_s20 + $0x328] sm:$0xff]  ;;  %4488 = vst [vmem:[#allocation15_spill] sm:$0xff] %v3484_v46 }
  0x65   : > { %2476 = vmatmul.mubr.f32.gmra.mrb[26].mxu1 %v3395_v17  ;;  %2797 = vmatprep.subr.bf16.mxu0 %v2796_v15  ;;  %v3598_v17 = vld [vmem:[%s2982_s20 + $0x1b0] sm:$0xff] }
  0x66   : > { %2765 = vmatpush1.bf16.msra.mxu1 %v2764_v18  ;;  %2478 = vmatprep.mubr.f32.mxu1 %v3406_v24  ;;  %v2240_v18 = vld [vmem:[%s4438_s1 + $0x400] sm:$0xff]  ;;  %v2225_v24 = vld [vmem:[%s4438_s1 + $0x388] sm:$0xff]  ;;  %4496 = vst [vmem:[#allocation23_spill] sm:$0xff] %v3598_v17 }
  0x67   : > { %466 = vmatmul.mubr.f32.gmra.mrb[12].mxu0 %v3416_v32  ;;  %2766 = vmatprep.subr.bf16.mxu1 %v2903_v3  ;;  %v3467_v31 = vpack.c.bf16 %v2241_v20, %v2240_v18  ;;  %v3500_v18 = vld [vmem:[%s2982_s20 + $0x140] sm:$0xff] }
  0x68   : > { %470 = vmatprep.mubr.f32.mxu0 %v3420_v33  ;;  %2799 = vmatpush3.bf16.msra.mxu0 %v2796_v15  ;;  %v3458_v15 = vld [vmem:[%s2982_s20 + $0x110] sm:$0xff]  ;;  %4490 = vst [vmem:[#allocation17_spill] sm:$0xff] %v3500_v18 }
  0x69   : > { %2479 = vmatmul.mubr.f32.gmra.mrb[28].mxu1 %v3424_v38  ;;  %2801 = vmatprep.subr.bf16.mxu0 %v2800_v36  ;;  %4486 = vst [vmem:[#allocation13_spill] sm:$0xff] %v3458_v15  ;;  %v3581_v38 = vld [vmem:[%s2982_s20 + $0x198] sm:$0xff] }
  0x6a   : > { %2768 = vmatpush1.bf16.msra.mxu1 %v2767_v41  ;;  %2481 = vmatprep.mubr.f32.mxu1 %v318_v44  ;;  %v2210_v41 = vld [vmem:[%s4438_s1 + $0x310] sm:$0xff]  ;;  %v2211_v44 = vld [vmem:[%s4438_s1 + $0x318] sm:$0xff]  ;;  %4494 = vst [vmem:[#allocation21_spill] sm:$0xff] %v3581_v38 }
  0x6b   : > { %471 = vmatmul.mubr.f32.gmra.mrb[14].mxu0 %v3437_v50  ;;  %2769 = vmatprep.subr.bf16.mxu1 %v2903_v3 }
  0x6c   : > { %475 = vmatprep.mubr.f32.mxu0 %v3441_v51  ;;  %2803 = vmatpush3.bf16.msra.mxu0 %v2800_v36  ;;  %v176_v36 = vld [vmem:[%s2982_s20 + $0x20] sm:$0xff] }
  0x6d   : > { %2482 = vmatmul.mubr.f32.gmra.mrb[30].mxu1 %v321_v55  ;;  %2853 = vmatprep.subr.bf16.mxu0 %v3467_v31  ;;  %v175_v55 = vld [vmem:[%s2982_s20 + $0x18] sm:$0xff] }
  0x6e   : > { %2771 = vmatpush1.bf16.msra.mxu1 %v2770_v59  ;;  %885 = vmatprep.mubr.f32.mxu1 %v173_v61  ;;  %v2808_v59 = vpack.c.bf16 %v2211_v44, %v2210_v41  ;;  %v2212_v61 = vld [vmem:[%s4438_s1 + $0x320] sm:$0xff] }
  0x6f   : > { %476 = vmatmul.mubr.f32.gmra.mrb[16].mxu0 %v3455_v7  ;;  %2804 = vmatprep.subr.bf16.mxu1 %v2903_v3  ;;  %v2811_v20 = vpack.c.bf16 %v2213_v0, %v2212_v61  ;;  %v2216_v44 = vld [vmem:[%s4438_s1 + $0x340] sm:$0xff]  ;;  %v2218_v61 = vld [vmem:[%s4438_s1 + $0x350] sm:$0xff]  ;;  %v3547_v0 = vld [vmem:[%s2982_s20 + $0x168] sm:$0xff] }
  0x70   : > { %480 = vmatprep.mubr.f32.mxu0 %v3458_v15 }
  0x71   : > { %886 = vmatmul.mubr.f32.vlgmr.msra.gmra.mrb[32].mxu1 %v172_v23  ;;  %v2214_v23 = vld [vmem:[%s4438_s1 + $0x330] sm:$0xff] }
  0x72   : > { %2806 = vmatpush1.bf16.msra.mxu1 %v2805_v28  ;;  %890 = vmatprep.mubr.f32.mxu1 %v176_v36  ;;  %v2215_v28 = vld [vmem:[%s4438_s1 + $0x338] sm:$0xff] }
  0x73   : > { %481 = vmatmul.mubr.f32.gmra.mrb[18].mxu0 %v3480_v45  ;;  %2807 = vmatprep.subr.bf16.mxu1 %v2903_v3  ;;  %v3513_v36 = vld [vmem:[%s2982_s20 + $0x138] sm:$0xff]  ;;  %v2814_v41 = vpack.c.bf16 %v2215_v28, %v2214_v23  ;;  %v2220_v28 = vld [vmem:[%s4438_s1 + $0x360] sm:$0xff] }
  0x74   : > { %485 = vmatprep.mubr.f32.mxu0 %v3484_v46  ;;  %4491 = vst [vmem:[#allocation18_spill] sm:$0xff] %v3513_v36 }
  0x75   : > { %891 = vmatmul.mubr.f32.gmra.mrb[34].mxu1 %v175_v55  ;;  %v3530_v55 = vld [vmem:[%s2982_s20 + $0x150] sm:$0xff] }
  0x76   : > { %895 = vmatprep.mubr.f32.mxu1 %v3045_v49  ;;  %2809 = vmatpush1.bf16.msra.mxu1 %v2808_v59  ;;  %v3517_v49 = vld [vmem:[%s2982_s20 + $0x158] sm:$0xff]  ;;  %4492 = vst [vmem:[#allocation19_spill] sm:$0xff] %v3530_v55 }
  0x77   : > { %486 = vmatmul.mubr.f32.gmra.mrb[20].mxu0 %v3497_v6  ;;  %2810 = vmatprep.subr.bf16.mxu1 %v2903_v3 }
  0x78   : > { %490 = vmatprep.mubr.f32.mxu0 %v3500_v18 }
  0x79   : > { %896 = vmatmul.mubr.f32.gmra.mrb[36].mxu1 %v3242_v62  ;;  %v2217_v62 = vld [vmem:[%s4438_s1 + $0x348] sm:$0xff] }
  0x7a   : > { %900 = vmatprep.mubr.f32.mxu1 %v3246_v63  ;;  %2812 = vmatpush1.bf16.msra.mxu1 %v2811_v20  ;;  %v3534_v63 = vld [vmem:[%s2982_s20 + $0x170] sm:$0xff]  ;;  %v2817_v59 = vpack.c.bf16 %v2217_v62, %v2216_v44  ;;  %v3551_v20 = vld [vmem:[%s2982_s20 + $0x188] sm:$0xff]  ;;  %v3564_v44 = vld [vmem:[%s2982_s20 + $0x180] sm:$0xff] }
  0x7b   : > { %491 = vmatmul.mubr.f32.gmra.mrb[22].mxu0 %v3513_v36  ;;  %2813 = vmatprep.subr.bf16.mxu1 %v2903_v3  ;;  %v3568_v62 = vld [vmem:[%s2982_s20 + $0x1a0] sm:$0xff] }
  0x7c   : > { %495 = vmatprep.mubr.f32.mxu0 %v3517_v49  ;;  %4493 = vst [vmem:[#allocation20_spill] sm:$0xff] %v3568_v62 }
  0x7d   : > { %901 = vmatmul.mubr.f32.gmra.mrb[38].mxu1 %v3271_v12  ;;  %v2219_v12 = vld [vmem:[%s4438_s1 + $0x358] sm:$0xff] }
  0x7e   : > { %905 = vmatprep.mubr.f32.mxu1 %v3275_v14  ;;  %2815 = vmatpush1.bf16.msra.mxu1 %v2814_v41  ;;  %v2820_v23 = vpack.c.bf16 %v2219_v12, %v2218_v61  ;;  %v2221_v41 = vld [vmem:[%s4438_s1 + $0x368] sm:$0xff]  ;;  %v2222_v61 = vld [vmem:[%s4438_s1 + $0x370] sm:$0xff]  ;;  %v2223_v12 = vld [vmem:[%s4438_s1 + $0x378] sm:$0xff] }
  0x7f   : > { %496 = vmatmul.mubr.f32.gmra.mrb[24].mxu0 %v3530_v55  ;;  %2816 = vmatprep.subr.bf16.mxu1 %v2903_v3 }
  0x80   : > { %500 = vmatprep.mubr.f32.mxu0 %v3534_v63 }
  0x81   : > { %906 = vmatmul.mubr.f32.gmra.mrb[40].mxu1 %v3300_v25 }
  0x82   : > { %910 = vmatprep.mubr.f32.mxu1 %v3304_v26  ;;  %2818 = vmatpush1.bf16.msra.mxu1 %v2817_v59  ;;  %v2823_v59 = vpack.c.bf16 %v2221_v41, %v2220_v28  ;;  %v2826_v28 = vpack.c.bf16 %v2223_v12, %v2222_v61  ;;  %v2224_v41 = vld [vmem:[%s4438_s1 + $0x380] sm:$0xff]  ;;  %v2226_v12 = vld [vmem:[%s4438_s1 + $0x390] sm:$0xff] }
  0x83   : > { %501 = vmatmul.mubr.f32.gmra.mrb[26].mxu0 %v3547_v0  ;;  %2819 = vmatprep.subr.bf16.mxu1 %v2903_v3  ;;  %v2829_v61 = vpack.c.bf16 %v2225_v24, %v2224_v41  ;;  %v3619_v24 = vld [vmem:[%s2982_s20 + $0x1e8] sm:$0xff]  ;;  %v2228_v41 = vld [vmem:[%s4438_s1 + $0x3a0] sm:$0xff] }
  0x84   : > { %505 = vmatprep.mubr.f32.mxu0 %v3551_v20  ;;  %4499 = vst [vmem:[#allocation26_spill] sm:$0xff] %v3619_v24 }
  0x85   : > { %911 = vmatmul.mubr.f32.gmra.mrb[42].mxu1 %v3329_v39 }
  0x86   : > { %915 = vmatprep.mubr.f32.mxu1 %v3333_v40  ;;  %2821 = vmatpush1.bf16.msra.mxu1 %v2820_v23  ;;  %v3585_v23 = vld [vmem:[%s2982_s20 + $0x1b8] sm:$0xff] }
  0x87   : > { %506 = vmatmul.mubr.f32.gmra.mrb[28].mxu0 %v3564_v44  ;;  %2822 = vmatprep.subr.bf16.mxu1 %v2903_v3  ;;  %4495 = vst [vmem:[#allocation22_spill] sm:$0xff] %v3585_v23 }
  0x88   : > { %510 = vmatprep.mubr.f32.mxu0 %v3568_v62 }
  0x89   : > { %916 = vmatmul.mubr.f32.gmra.mrb[44].mxu1 %v3358_v52 }
  0x8a   : > { %920 = vmatprep.mubr.f32.mxu1 %v3362_v54  ;;  %2824 = vmatpush1.bf16.msra.mxu1 %v2823_v59  ;;  %v3602_v59 = vld [vmem:[%s2982_s20 + $0x1d0] sm:$0xff] }
  0x8b   : > { %511 = vmatmul.mubr.f32.gmra.mrb[30].mxu0 %v3581_v38  ;;  %2825 = vmatprep.subr.bf16.mxu1 %v2903_v3  ;;  %4497 = vst [vmem:[#allocation24_spill] sm:$0xff] %v3602_v59 }
  0x8c   : > { %515 = vmatprep.mubr.f32.mxu0 %v3585_v23 }
  0x8d   : > { %921 = vmatmul.mubr.f32.gmra.mrb[46].mxu1 %v3387_v9 }
  0x8e   : > { %925 = vmatprep.mubr.f32.mxu1 %v3391_v10  ;;  %2827 = vmatpush1.bf16.msra.mxu1 %v2826_v28  ;;  %v2832_v28 = vpack.c.bf16 %v2227_v4, %v2226_v12  ;;  %v3636_v4 = vld [vmem:[%s2982_s20 + $0x200] sm:$0xff]  ;;  %v2230_v12 = vld [vmem:[%s4438_s1 + $0x3b0] sm:$0xff] }
  0x8f   : > { %516 = vmatmul.mubr.f32.gmra.mrb[32].mxu0 %v3598_v17  ;;  %2828 = vmatprep.subr.bf16.mxu1 %v2903_v3  ;;  %4501 = vst [vmem:[#allocation28_spill] sm:$0xff] %v3636_v4 }
  0x90   : > { %520 = vmatprep.mubr.f32.mxu0 %v3602_v59 }
  0x91   : > { %926 = vmatmul.mubr.f32.gmra.mrb[48].mxu1 %v3416_v32  ;;  %v2229_v32 = vld [vmem:[%s4438_s1 + $0x3a8] sm:$0xff] }
  0x92   : > { %930 = vmatprep.mubr.f32.mxu1 %v3420_v33  ;;  %2830 = vmatpush1.bf16.msra.mxu1 %v2829_v61  ;;  %v2835_v61 = vpack.c.bf16 %v2229_v32, %v2228_v41  ;;  %v3649_v33 = vld [vmem:[%s2982_s20 + $0x1f8] sm:$0xff]  ;;  %v2232_v41 = vld [vmem:[%s4438_s1 + $0x3c0] sm:$0xff] }
  0x93   : > { %521 = vmatmul.mubr.f32.gmra.mrb[34].mxu0 %v3615_v56  ;;  %2831 = vmatprep.subr.bf16.mxu1 %v2903_v3  ;;  %4502 = vst [vmem:[#allocation29_spill] sm:$0xff] %v3649_v33  ;;  %v3653_v32 = vld [vmem:[%s2982_s20 + $0x218] sm:$0xff] }
  0x94   : > { %525 = vmatprep.mubr.f32.mxu0 %v3619_v24  ;;  %4503 = vst [vmem:[#allocation30_spill] sm:$0xff] %v3653_v32 }
  0x95   : > { %931 = vmatmul.mubr.f32.gmra.mrb[50].mxu1 %v3437_v50  ;;  %v2231_v50 = vld [vmem:[%s4438_s1 + $0x3b8] sm:$0xff] }
  0x96   : > { %935 = vmatprep.mubr.f32.mxu1 %v3441_v51  ;;  %2833 = vmatpush1.bf16.msra.mxu1 %v2832_v28  ;;  %v2838_v28 = vpack.c.bf16 %v2231_v50, %v2230_v12  ;;  %v3666_v51 = vld [vmem:[%s2982_s20 + $0x210] sm:$0xff] }
  0x97   : > { %526 = vmatmul.mubr.f32.gmra.mrb[36].mxu0 %v3632_v48  ;;  %2834 = vmatprep.subr.bf16.mxu1 %v2903_v3  ;;  %4504 = vst [vmem:[#allocation31_spill] sm:$0xff] %v3666_v51  ;;  %v3670_v50 = vld [vmem:[%s2982_s20 + $0x230] sm:$0xff] }
  0x98   : > { %530 = vmatprep.mubr.f32.mxu0 %v3636_v4  ;;  %4505 = vst [vmem:[#allocation32_spill] sm:$0xff] %v3670_v50  ;;  %v2234_v12 = vld [vmem:[%s4438_s1 + $0x3d0] sm:$0xff] }
  0x99   : > { %936 = vmatmul.mubr.f32.gmra.mrb[52].mxu1 %v3455_v7  ;;  %v2233_v7 = vld [vmem:[%s4438_s1 + $0x3c8] sm:$0xff] }
  0x9a   : > { %940 = vmatprep.mubr.f32.mxu1 %v3458_v15  ;;  %2836 = vmatpush1.bf16.msra.mxu1 %v2835_v61  ;;  %v2841_v61 = vpack.c.bf16 %v2233_v7, %v2232_v41  ;;  %v3683_v15 = vld [vmem:[%s2982_s20 + $0x228] sm:$0xff]  ;;  %v2236_v41 = vld [vmem:[%s4438_s1 + $0x3e0] sm:$0xff] }
  0x9b   : > { %531 = vmatmul.mubr.f32.gmra.mrb[38].mxu0 %v3649_v33  ;;  %2837 = vmatprep.subr.bf16.mxu1 %v2903_v3  ;;  %v3687_v7 = vld [vmem:[%s2982_s20 + $0x248] sm:$0xff] }
  0x9c   : > { %535 = vmatprep.mubr.f32.mxu0 %v3653_v32 }
  0x9d   : > { %941 = vmatmul.mubr.f32.gmra.mrb[54].mxu1 %v3480_v45  ;;  %v2235_v45 = vld [vmem:[%s4438_s1 + $0x3d8] sm:$0xff] }
  0x9e   : > { %945 = vmatprep.mubr.f32.mxu1 %v3484_v46  ;;  %2839 = vmatpush1.bf16.msra.mxu1 %v2838_v28  ;;  %v2844_v28 = vpack.c.bf16 %v2235_v45, %v2234_v12  ;;  %v3700_v46 = vld [vmem:[%s2982_s20 + $0x240] sm:$0xff]  ;;  %v2238_v12 = vld [vmem:[%s4438_s1 + $0x3f0] sm:$0xff] }
  0x9f   : > { %536 = vmatmul.mubr.f32.gmra.mrb[40].mxu0 %v3666_v51  ;;  %2840 = vmatprep.subr.bf16.mxu1 %v2903_v3  ;;  %v3704_v45 = vld [vmem:[%s2982_s20 + $0x260] sm:$0xff] }
  0xa0   : > { %540 = vmatprep.mubr.f32.mxu0 %v3670_v50 }
  0xa1   : > { %946 = vmatmul.mubr.f32.gmra.mrb[56].mxu1 %v3497_v6  ;;  %v2237_v6 = vld [vmem:[%s4438_s1 + $0x3e8] sm:$0xff] }
  0xa2   : > { %950 = vmatprep.mubr.f32.mxu1 %v3500_v18  ;;  %2842 = vmatpush1.bf16.msra.mxu1 %v2841_v61  ;;  %v2847_v61 = vpack.c.bf16 %v2237_v6, %v2236_v41  ;;  %v3717_v18 = vld [vmem:[%s2982_s20 + $0x258] sm:$0xff]  ;;  %v3728_v41 = vld [vmem:[%s2982_s20 + $0x270] sm:$0xff] }
  0xa3   : > { %541 = vmatmul.mubr.f32.gmra.mrb[42].mxu0 %v3683_v15  ;;  %2843 = vmatprep.subr.bf16.mxu1 %v2903_v3  ;;  %v3721_v6 = vld [vmem:[%s2982_s20 + $0x278] sm:$0xff] }
  0xa4   : > { %545 = vmatprep.mubr.f32.mxu0 %v3687_v7 }
  0xa5   : > { %951 = vmatmul.mubr.f32.gmra.mrb[58].mxu1 %v3513_v36  ;;  %v2239_v36 = vld [vmem:[%s4438_s1 + $0x3f8] sm:$0xff] }
  0xa6   : > { %955 = vmatprep.mubr.f32.mxu1 %v3517_v49  ;;  %2845 = vmatpush1.bf16.msra.mxu1 %v2844_v28  ;;  %v2850_v28 = vpack.c.bf16 %v2239_v36, %v2238_v12  ;;  %v3738_v36 = vld [vmem:[%s2982_s20 + $0x288] sm:$0xff]  ;;  %v3752_v12 = vld [vmem:[%s2982_s20 + $0x2c0] sm:$0xff] }
  0xa7   : > { %546 = vmatmul.mubr.f32.gmra.mrb[44].mxu0 %v3700_v46  ;;  %2846 = vmatprep.subr.bf16.mxu1 %v2903_v3 }
  0xa8   : > { %550 = vmatprep.mubr.f32.mxu0 %v3704_v45 }
  0xa9   : > { %956 = vmatmul.mubr.f32.gmra.mrb[60].mxu1 %v3530_v55  ;;  %v3732_v55 = vld [vmem:[%s2982_s20 + $0x290] sm:$0xff] }
  0xaa   : > { %960 = vmatprep.mubr.f32.mxu1 %v3534_v63  ;;  %2848 = vmatpush1.bf16.msra.mxu1 %v2847_v61  ;;  %v3748_v61 = vld [vmem:[%s2982_s20 + $0x2a0] sm:$0xff] }
  0xab   : > { %551 = vmatmul.mubr.f32.gmra.mrb[46].mxu0 %v3717_v18  ;;  %2849 = vmatprep.subr.bf16.mxu1 %v2903_v3  ;;  %v3742_v3 = vld [vmem:[%s2982_s20 + $0x2a8] sm:$0xff] }
  0xac   : > { %555 = vmatprep.mubr.f32.mxu0 %v3721_v6 }
  0xad   : > { %961 = vmatmul.mubr.f32.gmra.mrb[62].mxu1 %v3547_v0 }
  0xae   : > { %965 = vmatprep.mubr.f32.mxu1 %v3551_v20  ;;  %2851 = vmatpush1.bf16.msra.mxu1 %v2850_v28  ;;  %v3758_v28 = vld [vmem:[%s2982_s20 + $0x2b8] sm:$0xff] }
  0xaf   : > { %556 = vmatmul.mubr.f32.gmra.mrb[48].mxu0 %v3728_v41 }
  0xb0   : > { %560 = vmatprep.mubr.f32.mxu0 %v3732_v55 }
  0xb1   : > { %966 = vmatmul.mubr.f32.gmra.mrb[64].mxu1 %v3564_v44 }
  0xb2   : > { %970 = vmatprep.mubr.f32.mxu1 %v3568_v62  ;;  %v3762_v62 = vld [vmem:[%s2982_s20 + $0x2d8] sm:$0xff] }
  0xb3   : > { %561 = vmatmul.mubr.f32.gmra.mrb[50].mxu0 %v3738_v36 }
  0xb4   : > { %565 = vmatprep.mubr.f32.mxu0 %v3742_v3 }
  0xb5   : > { %971 = vmatmul.mubr.f32.gmra.mrb[66].mxu1 %v3581_v38  ;;  %v3772_v38 = vld [vmem:[%s2982_s20 + $0x2f0] sm:$0xff] }
  0xb6   : > { %975 = vmatprep.mubr.f32.mxu1 %v3585_v23  ;;  %v3768_v23 = vld [vmem:[%s2982_s20 + $0x2d0] sm:$0xff] }
  0xb7   : > { %566 = vmatmul.mubr.f32.gmra.mrb[52].mxu0 %v3748_v61 }
  0xb8   : > { %570 = vmatprep.mubr.f32.mxu0 %v3752_v12 }
  0xb9   : > { %976 = vmatmul.mubr.f32.gmra.mrb[68].mxu1 %v3598_v17  ;;  %v3782_v17 = vld [vmem:[%s2982_s20 + $0x308] sm:$0xff] }
  0xba   : > { %980 = vmatprep.mubr.f32.mxu1 %v3602_v59  ;;  %v3778_v59 = vld [vmem:[%s2982_s20 + $0x2e8] sm:$0xff]  ;;  %4506 = vst [vmem:[#allocation33_spill] sm:$0xff] %v3782_v17 }
  0xbb   : > { %571 = vmatmul.mubr.f32.gmra.mrb[54].mxu0 %v3758_v28 }
  0xbc   : > { %575 = vmatprep.mubr.f32.mxu0 %v3762_v62 }
  0xbd   : > { %981 = vmatmul.mubr.f32.gmra.mrb[70].mxu1 %v3615_v56  ;;  %v3788_v56 = vld [vmem:[%s2982_s20 + $0x300] sm:$0xff] }
  0xbe   : > { %985 = vmatprep.mubr.f32.mxu1 %v3619_v24  ;;  %4507 = vst [vmem:[#allocation34_spill] sm:$0xff] %v3788_v56  ;;  %v3792_v24 = vld [vmem:[%s2982_s20 + $0x320] sm:$0xff] }
  0xbf   : > { %576 = vmatmul.mubr.f32.gmra.mrb[56].mxu0 %v3768_v23  ;;  %4508 = vst [vmem:[#allocation35_spill] sm:$0xff] %v3792_v24 }
  0xc0   : > { %580 = vmatprep.mubr.f32.mxu0 %v3772_v38 }
  0xc1   : > { %986 = vmatmul.mubr.f32.gmra.mrb[72].mxu1 %v3632_v48  ;;  %v3798_v48 = vld [vmem:[%s2982_s20 + $0x318] sm:$0xff] }
  0xc2   : > { %990 = vmatprep.mubr.f32.mxu1 %v3636_v4  ;;  %v174_v4 = vld [vmem:[%s2982_s20 + $0x10] sm:$0xff] }
  0xc3   : > { %581 = vmatmul.mubr.f32.gmra.mrb[58].mxu0 %v3778_v59 }
  0xc4   : > { %585 = vmatprep.mubr.f32.mxu0 %v3782_v17  ;;  %v2242_v17 = vld [vmem:[%s4438_s1 + $0x410] sm:$0xff] }
  0xc5   : > { %991 = vmatmul.mubr.f32.gmra.mrb[74].mxu1 %v3649_v33  ;;  %v2894_v33 = vld [vmem:[%s2982_s20 + $0x40] sm:$0xff] }
  0xc6   : > { %995 = vmatprep.mubr.f32.mxu1 %v3653_v32  ;;  %v2243_v32 = vld [vmem:[%s4438_s1 + $0x418] sm:$0xff] }
  0xc7   : > { %586 = vmatmul.mubr.f32.gmra.mrb[60].mxu0 %v3788_v56  ;;  %v2856_v56 = vpack.c.bf16 %v2243_v32, %v2242_v17  ;;  %v2246_v17 = vld [vmem:[%s4438_s1 + $0x430] sm:$0xff]  ;;  %v2247_v32 = vld [vmem:[%s4438_s1 + $0x438] sm:$0xff] }
  0xc8   : > { %590 = vmatprep.mubr.f32.mxu0 %v3792_v24  ;;  %v177_v24 = vld [vmem:[%s2982_s20 + $0x28] sm:$0xff] }
  0xc9   : > { %996 = vmatmul.mubr.f32.gmra.mrb[76].mxu1 %v3666_v51  ;;  %v2245_v51 = vld [vmem:[%s4438_s1 + $0x428] sm:$0xff] }
  0xca   : > { %1000 = vmatprep.mubr.f32.mxu1 %v3670_v50  ;;  %v2244_v50 = vld [vmem:[%s4438_s1 + $0x420] sm:$0xff] }
  0xcb   : > { %591 = vmatmul.mubr.f32.gmra.mrb[62].mxu0 %v3798_v48 }
  0xcc   : > { %2516 = vmatprep.mubr.f32.mxu0 %v174_v4  ;;  %v2860_v4 = vpack.c.bf16 %v2245_v51, %v2244_v50  ;;  %v2248_v51 = vld [vmem:[%s4438_s1 + $0x440] sm:$0xff]  ;;  %v2255_v50 = vld [vmem:[%s4438_s1 + $0x478] sm:$0xff] }
  0xcd   : > { %1001 = vmatmul.mubr.f32.gmra.mrb[78].mxu1 %v3683_v15 }
  0xce   : > { %1005 = vmatprep.mubr.f32.mxu1 %v3687_v7 }
  0xcf   : > { %2517 = vmatmul.mubr.f32.vlgmr.msra.gmra.mrb[64].mxu0 %v177_v24  ;;  %v2253_v24 = vld [vmem:[%s4438_s1 + $0x468] sm:$0xff] }
  0xd0   : > { %2519 = vmatprep.mubr.f32.mxu0 %v2894_v33  ;;  %2855 = vmatpush3.bf16.msra.mxu0 %v3467_v31  ;;  %v2864_v33 = vpack.c.bf16 %v2247_v32, %v2246_v17  ;;  %v2249_v31 = vld [vmem:[%s4438_s1 + $0x448] sm:$0xff]  ;;  %v4523_v17 = vld [vmem:[#allocation16_spill] sm:$0xff] }
  0xd1   : > { %1006 = vmatmul.mubr.f32.gmra.mrb[80].mxu1 %v3700_v46  ;;  %2857 = vmatprep.subr.bf16.mxu0 %v2856_v56  ;;  %v1285_v32 = vld [vmem:[%s2982_s20 + $0xd0] sm:$0xff] }
  0xd2   : > { %1010 = vmatprep.mubr.f32.mxu1 %v3704_v45 }
  0xd3   : > { %2520 = vmatmul.mubr.f32.gmra.mrb[66].mxu0 %v3069_v58  ;;  %v2868_v58 = vpack.c.bf16 %v2249_v31, %v2248_v51  ;;  %v1288_v31 = vld [vmem:[%s2982_s20 + $0xe8] sm:$0xff] }
  0xd4   : > { %2522 = vmatprep.mubr.f32.mxu0 %v3073_v60  ;;  %2859 = vmatpush3.bf16.msra.mxu0 %v2856_v56  ;;  %v2250_v60 = vld [vmem:[%s4438_s1 + $0x450] sm:$0xff]  ;;  %v2251_v56 = vld [vmem:[%s4438_s1 + $0x458] sm:$0xff] }
  0xd5   : > { %1011 = vmatmul.mubr.f32.gmra.mrb[82].mxu1 %v3717_v18  ;;  %2861 = vmatprep.subr.bf16.mxu0 %v2860_v4 }
  0xd6   : > { %1015 = vmatprep.mubr.f32.mxu1 %v3721_v6 }
  0xd7   : > { %2523 = vmatmul.mubr.f32.gmra.mrb[68].mxu0 %v3091_v2  ;;  %v2872_v2 = vpack.c.bf16 %v2251_v56, %v2250_v60  ;;  %v4525_v60 = vld [vmem:[#allocation18_spill] sm:$0xff] }
  0xd8   : > { %2525 = vmatprep.mubr.f32.mxu0 %v3095_v5  ;;  %2863 = vmatpush3.bf16.msra.mxu0 %v2860_v4  ;;  %v2252_v5 = vld [vmem:[%s4438_s1 + $0x460] sm:$0xff] }
  0xd9   : > { %1016 = vmatmul.mubr.f32.gmra.mrb[84].mxu1 %v3728_v41  ;;  %2865 = vmatprep.subr.bf16.mxu0 %v2864_v33  ;;  %v1291_v56 = vld [vmem:[%s2982_s20 + $0x100] sm:$0xff] }
  0xda   : > { %1020 = vmatprep.mubr.f32.mxu1 %v3732_v55 }
  0xdb   : > { %2526 = vmatmul.mubr.f32.gmra.mrb[70].mxu0 %v3113_v11  ;;  %v2876_v11 = vpack.c.bf16 %v2253_v24, %v2252_v5  ;;  %v1294_v5 = vld [vmem:[%s2982_s20 + $0x118] sm:$0xff] }
  0xdc   : > { %2528 = vmatprep.mubr.f32.mxu0 %v3117_v13  ;;  %2867 = vmatpush3.bf16.msra.mxu0 %v2864_v33  ;;  %v2254_v13 = vld [vmem:[%s4438_s1 + $0x470] sm:$0xff]  ;;  %v4524_v33 = vld [vmem:[#allocation17_spill] sm:$0xff] }
  0xdd   : > { %1021 = vmatmul.mubr.f32.gmra.mrb[86].mxu1 %v3738_v36  ;;  %2869 = vmatprep.subr.bf16.mxu0 %v2868_v58 }
  0xde   : > { %1025 = vmatprep.mubr.f32.mxu1 %v3742_v3 }
  0xdf   : > { %2529 = vmatmul.mubr.f32.gmra.mrb[72].mxu0 %v3135_v19  ;;  %v2880_v19 = vpack.c.bf16 %v2255_v50, %v2254_v13  ;;  %v1297_v13 = vld [vmem:[%s2982_s20 + $0x130] sm:$0xff] }
  0xe0   : > { %2531 = vmatprep.mubr.f32.mxu0 %v3139_v21  ;;  %2871 = vmatpush3.bf16.msra.mxu0 %v2868_v58  ;;  %v4509_v21 = vld [vmem:[#allocation2_spill] sm:$0xff] }
  0xe1   : > { %1026 = vmatmul.mubr.f32.gmra.mrb[88].mxu1 %v3748_v61  ;;  %2873 = vmatprep.subr.bf16.mxu0 %v2872_v2 }
  0xe2   : > { %1030 = vmatprep.mubr.f32.mxu1 %v3752_v12 }
  0xe3   : > { %2532 = vmatmul.mubr.f32.gmra.mrb[74].mxu0 %v3157_v27  ;;  %v4510_v27 = vld [vmem:[#allocation7_spill] sm:$0xff] }
  0xe4   : > { %2534 = vmatprep.mubr.f32.mxu0 %v3161_v29  ;;  %2875 = vmatpush3.bf16.msra.mxu0 %v2872_v2  ;;  %v4511_v29 = vld [vmem:[#allocation8_spill] sm:$0xff] }
  0xe5   : > { %1031 = vmatmul.mubr.f32.gmra.mrb[90].mxu1 %v3758_v28  ;;  %2877 = vmatprep.subr.bf16.mxu0 %v2876_v11 }
  0xe6   : > { %1035 = vmatprep.mubr.f32.mxu1 %v3762_v62 }
  0xe7   : > { %2535 = vmatmul.mubr.f32.gmra.mrb[76].mxu0 %v3179_v35  ;;  %v4512_v35 = vld [vmem:[#allocation3_spill] sm:$0xff] }
  0xe8   : > { %2537 = vmatprep.mubr.f32.mxu0 %v3183_v37  ;;  %2879 = vmatpush3.bf16.msra.mxu0 %v2876_v11  ;;  %v4526_v11 = vld [vmem:[#allocation19_spill] sm:$0xff] }
  0xe9   : > { %1036 = vmatmul.mubr.f32.gmra.mrb[92].mxu1 %v3768_v23  ;;  %2881 = vmatprep.subr.bf16.mxu0 %v2880_v19 }
  0xea   : > { %1040 = vmatprep.mubr.f32.mxu1 %v3772_v38 }
  0xeb   : > { %2538 = vmatmul.mubr.f32.gmra.mrb[78].mxu0 %v3201_v43  ;;  %v4513_v43 = vld [vmem:[#allocation4_spill] sm:$0xff] }
  0xec   : > { %2540 = vmatprep.mubr.f32.mxu0 %v3211_v47  ;;  %2883 = vmatpush3.bf16.msra.mxu0 %v2880_v19  ;;  %v1300_v19 = vld [vmem:[%s2982_s20 + $0x148] sm:$0xff] }
  0xed   : > { %1041 = vmatmul.mubr.f32.gmra.mrb[94].mxu1 %v3778_v59 }
  0xee   : > { %1480 = vmatprep.mubr.f32.mxu1 %v3275_v14  ;;  %v4517_v14 = vld [vmem:[#allocation6_spill] sm:$0xff] }
  0xef   : > { %2541 = vmatmul.mubr.f32.gmra.mrb[80].mxu0 %v3223_v53  ;;  %v4514_v53 = vld [vmem:[#allocation10_spill] sm:$0xff] }
  0xf0   : > { %2543 = vmatprep.mubr.f32.mxu0 %v3233_v57  ;;  %v4515_v57 = vld [vmem:[#allocation11_spill] sm:$0xff] }
  0xf1   : > { %1481 = vmatmul.mubr.f32.vlgmr.msra.gmra.mrb[96].mxu1 %v3300_v25  ;;  %v1273_v25 = vld [vmem:[%s2982_s20 + $0x70] sm:$0xff] }
  0xf2   : > { %1485 = vmatprep.mubr.f32.mxu1 %v3304_v26  ;;  %v4519_v26 = vld [vmem:[#allocation13_spill] sm:$0xff] }
  0xf3   : > { %2544 = vmatmul.mubr.f32.gmra.mrb[82].mxu0 %v3250_v1  ;;  %v4516_v1 = vld [vmem:[#allocation5_spill] sm:$0xff] }
  0xf4   : > { %2546 = vmatprep.mubr.f32.mxu0 %v3261_v8 }
  0xf5   : > { %1486 = vmatmul.mubr.f32.gmra.mrb[98].mxu1 %v3329_v39  ;;  %v1276_v39 = vld [vmem:[%s2982_s20 + $0x88] sm:$0xff] }
  0xf6   : > { %1490 = vmatprep.mubr.f32.mxu1 %v3333_v40 }
  0xf7   : > { %2547 = vmatmul.mubr.f32.gmra.mrb[84].mxu0 %v3279_v16 }
  0xf8   : > { %2549 = vmatprep.mubr.f32.mxu0 %v3290_v22  ;;  %v4518_v22 = vld [vmem:[#allocation12_spill] sm:$0xff] }
  0xf9   : > { %1491 = vmatmul.mubr.f32.gmra.mrb[100].mxu1 %v3358_v52  ;;  %v1279_v52 = vld [vmem:[%s2982_s20 + $0xa0] sm:$0xff] }
  0xfa   : > { %1495 = vmatprep.mubr.f32.mxu1 %v3362_v54  ;;  %v4522_v54 = vld [vmem:[#allocation15_spill] sm:$0xff] }
  0xfb   : > { %2550 = vmatmul.mubr.f32.gmra.mrb[86].mxu0 %v3308_v30  ;;  %v4520_v30 = vld [vmem:[#allocation9_spill] sm:$0xff] }
  0xfc   : > { %2552 = vmatprep.mubr.f32.mxu0 %v3319_v34 }
  0xfd   : > { %1496 = vmatmul.mubr.f32.gmra.mrb[102].mxu1 %v3387_v9 }
  0xfe   : > { %1500 = vmatprep.mubr.f32.mxu1 %v3391_v10  ;;  %v1282_v10 = vld [vmem:[%s2982_s20 + $0xb8] sm:$0xff] }
  0xff   : > { %2553 = vmatmul.mubr.f32.gmra.mrb[88].mxu0 %v3337_v42  ;;  %v4521_v42 = vld [vmem:[#allocation14_spill] sm:$0xff] }
 0x100   : > { %2555 = vmatprep.mubr.f32.mxu0 %v4509_v21  ;;  %v1303_v21 = vld [vmem:[%s2982_s20 + $0x160] sm:$0xff] }
 0x101   : > { %1501 = vmatmul.mubr.f32.gmra.mrb[104].mxu1 %v4510_v27 }
 0x102   : > { %1505 = vmatprep.mubr.f32.mxu1 %v4511_v29  ;;  %v1306_v29 = vld [vmem:[%s2982_s20 + $0x178] sm:$0xff] }
 0x103   : > { %2556 = vmatmul.mubr.f32.gmra.mrb[90].mxu0 %v4512_v35  ;;  %v1309_v35 = vld [vmem:[%s2982_s20 + $0x190] sm:$0xff] }
 0x104   : > { %v3902_v37 = vpop.f32.mrb[0].mxu1  ;;  %2558 = vmatprep.mubr.f32.mxu0 %v4513_v43 }
 0x105   : > { %v662_v47 = vpop.f32.mrb[1].mxu1  ;;  %1506 = vmatmul.mubr.f32.gmra.mrb[106].mxu1 %v4514_v53  ;;  %v4527_v53 = vld [vmem:[#allocation20_spill] sm:$0xff] }
 0x106   : > { %1510 = vmatprep.mubr.f32.mxu1 %v4515_v57 }
 0x107   : > { %2559 = vmatmul.mubr.f32.gmra.mrb[92].mxu0 %v4516_v1  ;;  %v1312_v1 = vld [vmem:[%s2982_s20 + $0x1a8] sm:$0xff] }
 0x108   : > { %v3908_v8 = vpop.f32.mrb[2].mxu1  ;;  %2561 = vmatprep.mubr.f32.mxu0 %v4517_v14 }
 0x109   : > { %v3911_v16 = vpop.f32.mrb[3].mxu1  ;;  %1511 = vmatmul.mubr.f32.gmra.mrb[108].mxu1 %v4518_v22  ;;  %v4528_v22 = vld [vmem:[#allocation21_spill] sm:$0xff] }
 0x10a   : > { %1515 = vmatprep.mubr.f32.mxu1 %v4519_v26  ;;  %v4529_v26 = vld [vmem:[#allocation22_spill] sm:$0xff] }
 0x10b   : > { %2562 = vmatmul.mubr.f32.gmra.mrb[94].mxu0 %v4520_v30 }
 0x10c   : > { %v3917_v34 = vpop.f32.mrb[4].mxu1  ;;  %2596 = vmatprep.mubr.f32.mxu0 %v1273_v25  ;;  %v1315_v25 = vld [vmem:[%s2982_s20 + $0x1c0] sm:$0xff] }
 0x10d   : > { %v3920_v40 = vpop.f32.mrb[5].mxu1  ;;  %1516 = vmatmul.mubr.f32.gmra.mrb[110].mxu1 %v4521_v42  ;;  %v1318_v42 = vld [vmem:[%s2982_s20 + $0x1d8] sm:$0xff] }
 0x10e   : > { %1520 = vmatprep.mubr.f32.mxu1 %v4522_v54  ;;  %v4530_v54 = vld [vmem:[#allocation23_spill] sm:$0xff] }
 0x10f   : > { %2597 = vmatmul.mubr.f32.vlgmr.msra.gmra.mrb[96].mxu0 %v1276_v39 }
 0x110   : > { %v3925_v9 = vpop.f32.mrb[6].mxu1  ;;  %2599 = vmatprep.mubr.f32.mxu0 %v1279_v52 }
 0x111   : > { %v3928_v4 = vpop.f32.mrb[7].mxu1  ;;  %1521 = vmatmul.mubr.f32.gmra.mrb[112].mxu1 %v4523_v17 }
 0x112   : > { %1525 = vmatprep.mubr.f32.mxu1 %v4524_v33 }
 0x113   : > { %2600 = vmatmul.mubr.f32.gmra.mrb[98].mxu0 %v1282_v10  ;;  %v1321_v10 = vld [vmem:[%s2982_s20 + $0x1f0] sm:$0xff] }
 0x114   : > { %v3933_v51 = vpop.f32.mrb[8].mxu1  ;;  %2602 = vmatprep.mubr.f32.mxu0 %v1285_v32  ;;  %v4531_v32 = vld [vmem:[#allocation24_spill] sm:$0xff] }
 0x115   : > { %v3936_v58 = vpop.f32.mrb[9].mxu1  ;;  %1526 = vmatmul.mubr.f32.gmra.mrb[114].mxu1 %v4525_v60  ;;  %v1324_v60 = vld [vmem:[%s2982_s20 + $0x208] sm:$0xff] }
 0x116   : > { %1530 = vmatprep.mubr.f32.mxu1 %v3517_v49 }
 0x117   : > { %2603 = vmatmul.mubr.f32.gmra.mrb[100].mxu0 %v1288_v31 }
 0x118   : > { %v3941_v2 = vpop.f32.mrb[10].mxu1  ;;  %2605 = vmatprep.mubr.f32.mxu0 %v1291_v56 }
 0x119   : > { %v3944_v24 = vpop.f32.mrb[11].mxu1  ;;  %1531 = vmatmul.mubr.f32.gmra.mrb[116].mxu1 %v4526_v11  ;;  %v1327_v11 = vld [vmem:[%s2982_s20 + $0x220] sm:$0xff] }
 0x11a   : > { %1535 = vmatprep.mubr.f32.mxu1 %v3534_v63 }
 0x11b   : > { %2606 = vmatmul.mubr.f32.gmra.mrb[102].mxu0 %v1294_v5  ;;  %v4532_v5 = vld [vmem:[#allocation25_spill] sm:$0xff] }
 0x11c   : > { %v3949_v50 = vpop.f32.mrb[12].mxu1  ;;  %2608 = vmatprep.mubr.f32.mxu0 %v1297_v13 }
 0x11d   : > { %v3952_v49 = vpop.f32.mrb[13].mxu1  ;;  %1536 = vmatmul.mubr.f32.gmra.mrb[118].mxu1 %v3547_v0 }
 0x11e   : > { %1540 = vmatprep.mubr.f32.mxu1 %v3551_v20 }
 0x11f   : > { %2609 = vmatmul.mubr.f32.gmra.mrb[104].mxu0 %v1300_v19  ;;  %v4533_v19 = vld [vmem:[#allocation26_spill] sm:$0xff] }
 0x120   : > { %v3957_v27 = vpop.f32.mrb[14].mxu1  ;;  %2611 = vmatprep.mubr.f32.mxu0 %v1303_v21 }
 0x121   : > { %v3960_v63 = vpop.f32.mrb[15].mxu1  ;;  %1541 = vmatmul.mubr.f32.gmra.mrb[120].mxu1 %v3564_v44 }
 0x122   : > { %v437_v43 = vpop.f32.mrb[0].mxu0  ;;  %1545 = vmatprep.mubr.f32.mxu1 %v4527_v53  ;;  %v4534_v53 = vld [vmem:[#allocation27_spill] sm:$0xff] }
 0x123   : > { %v3965_v57 = vadd.f32 %v662_v47, %v437_v43  ;;  %2612 = vmatmul.mubr.f32.gmra.mrb[106].mxu0 %v1306_v29  ;;  %v439_v0 = vpop.f32.mrb[1].mxu0 }
 0x124   : > { %v3967_v20 = vpop.f32.mrb[16].mxu1  ;;  %2614 = vmatprep.mubr.f32.mxu0 %v1309_v35  ;;  %v1330_v35 = vld [vmem:[%s2982_s20 + $0x238] sm:$0xff]  ;;  %v1333_v0 = vld [vmem:[%s2982_s20 + $0x250] sm:$0xff] }
 0x125   : > { %v3970_v14 = vpop.f32.mrb[17].mxu1  ;;  %1546 = vmatmul.mubr.f32.gmra.mrb[122].mxu1 %v4528_v22  ;;  %v4535_v22 = vld [vmem:[#allocation28_spill] sm:$0xff] }
 0x126   : > { %v442_v44 = vpop.f32.mrb[2].mxu0  ;;  %1550 = vmatprep.mubr.f32.mxu1 %v4529_v26  ;;  %v1336_v26 = vld [vmem:[%s2982_s20 + $0x268] sm:$0xff] }
 0x127   : > { %v3976_v30 = vadd.f32 %v3902_v37, %v442_v44  ;;  %2615 = vmatmul.mubr.f32.gmra.mrb[108].mxu0 %v1312_v1  ;;  %v444_v47 = vpop.f32.mrb[3].mxu0 }
 0x128   : > { %v3978_v39 = vpop.f32.mrb[18].mxu1  ;;  %2617 = vmatprep.mubr.f32.mxu0 %v1315_v25 }
 0x129   : > { %v3981_v52 = vpop.f32.mrb[19].mxu1  ;;  %1551 = vmatmul.mubr.f32.gmra.mrb[124].mxu1 %v4530_v54  ;;  %v1339_v54 = vld [vmem:[%s2982_s20 + $0x280] sm:$0xff] }
 0x12a   : > { %v447_v17 = vpop.f32.mrb[4].mxu0  ;;  %1555 = vmatprep.mubr.f32.mxu1 %v4531_v32 }
 0x12b   : > { %v3987_v33 = vadd.f32 %v3911_v16, %v447_v17  ;;  %2618 = vmatmul.mubr.f32.gmra.mrb[110].mxu0 %v1318_v42  ;;  %v449_v37 = vpop.f32.mrb[5].mxu0  ;;  %v4536_v42 = vld [vmem:[#allocation29_spill] sm:$0xff]  ;;  %v4537_v17 = vld [vmem:[#allocation30_spill] sm:$0xff] }
 0x12c   : > { %v3989_v31 = vpop.f32.mrb[20].mxu1  ;;  %2620 = vmatprep.mubr.f32.mxu0 %v1321_v10 }
 0x12d   : > { %v3992_v56 = vpop.f32.mrb[21].mxu1  ;;  %1556 = vmatmul.mubr.f32.gmra.mrb[126].mxu1 %v4532_v5 }
 0x12e   : > { %v452_v13 = vpop.f32.mrb[6].mxu0  ;;  %1560 = vmatprep.mubr.f32.mxu1 %v4533_v19 }
 0x12f   : > { %v3998_v21 = vadd.f32 %v3908_v8, %v452_v13  ;;  %2621 = vmatmul.mubr.f32.gmra.mrb[112].mxu0 %v1324_v60  ;;  %v454_v16 = vpop.f32.mrb[7].mxu0  ;;  %v1342_v60 = vld [vmem:[%s2982_s20 + $0x298] sm:$0xff]  ;;  %v1345_v13 = vld [vmem:[%s2982_s20 + $0x2b0] sm:$0xff] }
 0x130   : > { %v4000_v29 = vpop.f32.mrb[22].mxu1  ;;  %2623 = vmatprep.mubr.f32.mxu0 %v1327_v11  ;;  %v4538_v11 = vld [vmem:[#allocation31_spill] sm:$0xff]  ;;  %v4539_v16 = vld [vmem:[#allocation32_spill] sm:$0xff] }
 0x131   : > { %v4003_v43 = vpop.f32.mrb[23].mxu1  ;;  %1561 = vmatmul.mubr.f32.gmra.mrb[128].mxu1 %v4534_v53 }
 0x132   : > { %v457_v1 = vpop.f32.mrb[8].mxu0  ;;  %1565 = vmatprep.mubr.f32.mxu1 %v4535_v22  ;;  %v1351_v22 = vld [vmem:[%s2982_s20 + $0x2e0] sm:$0xff] }
 0x133   : > { %v4009_v25 = vadd.f32 %v3920_v40, %v457_v1  ;;  %v459_v8 = vpop.f32.mrb[9].mxu0  ;;  %2624 = vmatmul.mubr.f32.gmra.mrb[114].mxu0 %v1330_v35 }
 0x134   : > { %v4011_v44 = vpop.f32.mrb[24].mxu1  ;;  %2626 = vmatprep.mubr.f32.mxu0 %v1333_v0  ;;  %v1348_v0 = vld [vmem:[%s2982_s20 + $0x2c8] sm:$0xff] }
 0x135   : > { %v4014_v47 = vpop.f32.mrb[25].mxu1  ;;  %1566 = vmatmul.mubr.f32.gmra.mrb[130].mxu1 %v4536_v42 }
 0x136   : > { %v462_v10 = vpop.f32.mrb[10].mxu0  ;;  %1570 = vmatprep.mubr.f32.mxu1 %v4537_v17 }
 0x137   : > { %v4020_v32 = vadd.f32 %v3917_v34, %v462_v10  ;;  %v464_v40 = vpop.f32.mrb[11].mxu0  ;;  %2627 = vmatmul.mubr.f32.gmra.mrb[116].mxu0 %v1336_v26 }
 0x138   : > { %v4022_v37 = vpop.f32.mrb[26].mxu1  ;;  %2629 = vmatprep.mubr.f32.mxu0 %v1339_v54  ;;  %v1354_v54 = vld [vmem:[%s2982_s20 + $0x2f8] sm:$0xff] }
 0x139   : > { %v4025_v5 = vpop.f32.mrb[27].mxu1  ;;  %1571 = vmatmul.mubr.f32.gmra.mrb[132].mxu1 %v4538_v11 }
 0x13a   : > { %v467_v19 = vpop.f32.mrb[12].mxu0  ;;  %1575 = vmatprep.mubr.f32.mxu1 %v4539_v16 }
 0x13b   : > { %v4031_v35 = vadd.f32 %v3928_v4, %v467_v19  ;;  %v469_v34 = vpop.f32.mrb[13].mxu0  ;;  %2630 = vmatmul.mubr.f32.gmra.mrb[118].mxu0 %v1342_v60  ;;  %v1360_v60 = vld [vmem:[%s2982_s20 + $0x328] sm:$0xff] }
 0x13c   : > { %v4033_v53 = vpop.f32.mrb[28].mxu1  ;;  %2632 = vmatprep.mubr.f32.mxu0 %v1345_v13  ;;  %v1366_v34 = vld [vmem:[%s2982_s20 + $0x358] sm:$0xff] }
 0x13d   : > { %v4036_v1 = vpop.f32.mrb[29].mxu1  ;;  %1576 = vmatmul.mubr.f32.gmra.mrb[134].mxu1 %v3683_v15  ;;  %v1357_v15 = vld [vmem:[%s2982_s20 + $0x310] sm:$0xff] }
 0x13e   : > { %v472_v8 = vpop.f32.mrb[14].mxu0  ;;  %1580 = vmatprep.mubr.f32.mxu1 %v3687_v7 }
 0x13f   : > { %v4042_v26 = vadd.f32 %v3925_v9, %v472_v8  ;;  %v474_v4 = vpop.f32.mrb[15].mxu0  ;;  %2633 = vmatmul.mubr.f32.gmra.mrb[120].mxu0 %v1348_v0 }
 0x140   : > { %v4044_v42 = vpop.f32.mrb[30].mxu1  ;;  %2635 = vmatprep.mubr.f32.mxu0 %v1351_v22 }
 0x141   : > { %v4047_v10 = vpop.f32.mrb[31].mxu1  ;;  %1581 = vmatmul.mubr.f32.gmra.mrb[136].mxu1 %v3700_v46  ;;  %v1363_v46 = vld [vmem:[%s2982_s20 + $0x340] sm:$0xff] }
 0x142   : > { %v477_v17 = vpop.f32.mrb[16].mxu0  ;;  %1585 = vmatprep.mubr.f32.mxu1 %v3704_v45 }
 0x143   : > { %v4053_v7 = vadd.f32 %v3936_v58, %v477_v17  ;;  %v479_v9 = vpop.f32.mrb[17].mxu0  ;;  %2636 = vmatmul.mubr.f32.gmra.mrb[122].mxu0 %v1354_v54 }
 0x144   : > { %v887_v40 = vpop.f32.mrb[32].mxu1  ;;  %2638 = vmatprep.mubr.f32.mxu0 %v1357_v15 }
 0x145   : > { %v4057_v11 = vadd.f32 %v887_v40, %v3965_v57  ;;  %v889_v13 = vpop.f32.mrb[33].mxu1  ;;  %1586 = vmatmul.mubr.f32.gmra.mrb[138].mxu1 %v3717_v18 }
 0x146   : > { %v482_v19 = vpop.f32.mrb[18].mxu0  ;;  %1590 = vmatprep.mubr.f32.mxu1 %v3721_v6 }
 0x147   : > { %v4063_v45 = vadd.f32 %v3933_v51, %v482_v19  ;;  %v484_v58 = vpop.f32.mrb[19].mxu0  ;;  %2639 = vmatmul.mubr.f32.gmra.mrb[124].mxu0 %v1360_v60  ;;  %v4540_v19 = vld [vmem:[#allocation33_spill] sm:$0xff] }
 0x148   : > { %v892_v16 = vpop.f32.mrb[34].mxu1  ;;  %2641 = vmatprep.mubr.f32.mxu0 %v1363_v46 }
 0x149   : > { %v4067_v0 = vadd.f32 %v892_v16, %v3976_v30  ;;  %v894_v57 = vpop.f32.mrb[35].mxu1  ;;  %1591 = vmatmul.mubr.f32.gmra.mrb[140].mxu1 %v3728_v41 }
 0x14a   : > { %v487_v22 = vpop.f32.mrb[20].mxu0  ;;  %1595 = vmatprep.mubr.f32.mxu1 %v3732_v55  ;;  %v4542_v57 = vld [vmem:[#allocation35_spill] sm:$0xff] }
 0x14b   : > { %v4072_v18 = vadd.f32 %v3944_v24, %v487_v22  ;;  %v489_v6 = vpop.f32.mrb[21].mxu0  ;;  %2642 = vmatmul.mubr.f32.gmra.mrb[126].mxu0 %v1366_v34  ;;  %v4541_v34 = vld [vmem:[#allocation34_spill] sm:$0xff] }
 0x14c   : > { %v897_v51 = vpop.f32.mrb[36].mxu1  ;;  %v1362_v6 = vld [vmem:[%s2982_s20 + $0x338] sm:$0xff] }
 0x14d   : > { %v4075_v8 = vadd.f32 %v897_v51, %v3987_v33  ;;  %v899_v4 = vpop.f32.mrb[37].mxu1  ;;  %1596 = vmatmul.mubr.f32.gmra.mrb[142].mxu1 %v3738_v36 }
 0x14e   : > { %v492_v30 = vpop.f32.mrb[22].mxu0  ;;  %1600 = vmatprep.mubr.f32.mxu1 %v3742_v3 }
 0x14f   : > { %v4080_v41 = vadd.f32 %v3941_v2, %v492_v30  ;;  %v494_v54 = vpop.f32.mrb[23].mxu0  ;;  %v1361_v30 = vld [vmem:[%s2982_s20 + $0x330] sm:$0xff] }
 0x150   : > { %v902_v55 = vpop.f32.mrb[38].mxu1 }
 0x151   : > { %v4083_v24 = vadd.f32 %v902_v55, %v3998_v21  ;;  %v904_v15 = vpop.f32.mrb[39].mxu1  ;;  %1601 = vmatmul.mubr.f32.gmra.mrb[144].mxu1 %v3748_v61 }
 0x152   : > { %v497_v17 = vpop.f32.mrb[24].mxu0  ;;  %1605 = vmatprep.mubr.f32.mxu1 %v3752_v12  ;;  %v1365_v15 = vld [vmem:[%s2982_s20 + $0x350] sm:$0xff] }
 0x153   : > { %v4088_v33 = vadd.f32 %v3952_v49, %v497_v17  ;;  %v499_v36 = vpop.f32.mrb[25].mxu0 }
 0x154   : > { %v907_v9 = vpop.f32.mrb[40].mxu1 }
 0x155   : > { %v4091_v3 = vadd.f32 %v907_v9, %v4009_v25  ;;  %v909_v2 = vpop.f32.mrb[41].mxu1  ;;  %1606 = vmatmul.mubr.f32.gmra.mrb[146].mxu1 %v3758_v28 }
 0x156   : > { %v502_v40 = vpop.f32.mrb[26].mxu0  ;;  %1610 = vmatprep.mubr.f32.mxu1 %v3762_v62 }
 0x157   : > { %v4096_v21 = vadd.f32 %v3949_v50, %v502_v40  ;;  %v504_v61 = vpop.f32.mrb[27].mxu0 }
 0x158   : > { %v912_v60 = vpop.f32.mrb[42].mxu1 }
 0x159   : > { %v4099_v12 = vadd.f32 %v912_v60, %v4020_v32  ;;  %v914_v49 = vpop.f32.mrb[43].mxu1  ;;  %1611 = vmatmul.mubr.f32.gmra.mrb[148].mxu1 %v3768_v23 }
 0x15a   : > { %v507_v13 = vpop.f32.mrb[28].mxu0  ;;  %1615 = vmatprep.mubr.f32.mxu1 %v3772_v38 }
 0x15b   : > { %v4104_v25 = vadd.f32 %v3960_v63, %v507_v13  ;;  %v509_v28 = vpop.f32.mrb[29].mxu0 }
 0x15c   : > { %v917_v46 = vpop.f32.mrb[44].mxu1 }
 0x15d   : > { %v4107_v62 = vadd.f32 %v917_v46, %v4031_v35  ;;  %v919_v50 = vpop.f32.mrb[45].mxu1  ;;  %1616 = vmatmul.mubr.f32.gmra.mrb[150].mxu1 %v3778_v59 }
 0x15e   : > { %v512_v32 = vpop.f32.mrb[30].mxu0  ;;  %1620 = vmatprep.mubr.f32.mxu1 %v4540_v19 }
 0x15f   : > { %v738_v23 = vadd.f32 %v3957_v27, %v512_v32  ;;  %v514_v58 = vpop.f32.mrb[31].mxu0 }
 0x160   : > { %v922_v38 = vpop.f32.mrb[46].mxu1 }
 0x161   : > { %v4113_v63 = vadd.f32 %v922_v38, %v4042_v26  ;;  %v924_v16 = vpop.f32.mrb[47].mxu1  ;;  %1621 = vmatmul.mubr.f32.gmra.mrb[152].mxu1 %v4541_v34 }
 0x162   : > { %v517_v35 = vpop.f32.mrb[32].mxu0  ;;  %1625 = vmatprep.mubr.f32.mxu1 %v4542_v57 }
 0x163   : > { %v743_v59 = vadd.f32 %v3970_v14, %v517_v35  ;;  %v519_v22 = vpop.f32.mrb[33].mxu0 }
 0x164   : > { %v927_v51 = vpop.f32.mrb[48].mxu1 }
 0x165   : > { %v4120_v27 = vadd.f32 %v927_v51, %v4053_v7  ;;  %v929_v4 = vpop.f32.mrb[49].mxu1  ;;  %1626 = vmatmul.mubr.f32.gmra.mrb[154].mxu1 %v3798_v48  ;;  %v1364_v7 = vld [vmem:[%s2982_s20 + $0x348] sm:$0xff] }
 0x166   : > { %v522_v26 = vpop.f32.mrb[34].mxu0  ;;  %1630 = vmatprep.mubr.f32.mxu1 %v1362_v6 }
 0x167   : > { %v748_v54 = vadd.f32 %v3967_v20, %v522_v26  ;;  %v524_v55 = vpop.f32.mrb[35].mxu0 }
 0x168   : > { %v932_v17 = vpop.f32.mrb[50].mxu1 }
 0x169   : > { %v4127_v14 = vadd.f32 %v932_v17, %v4063_v45  ;;  %v934_v36 = vpop.f32.mrb[51].mxu1  ;;  %1631 = vmatmul.mubr.f32.gmra.mrb[156].mxu1 %v1361_v30 }
 0x16a   : > { %v527_v9 = vpop.f32.mrb[36].mxu0  ;;  %1635 = vmatprep.mubr.f32.mxu1 %v1365_v15 }
 0x16b   : > { %v753_v2 = vadd.f32 %v3981_v52, %v527_v9  ;;  %v529_v40 = vpop.f32.mrb[37].mxu0 }
 0x16c   : > { %v937_v48 = vpop.f32.mrb[52].mxu1 }
 0x16d   : > { %v4132_v61 = vadd.f32 %v937_v48, %v4072_v18  ;;  %v939_v60 = vpop.f32.mrb[53].mxu1  ;;  %1636 = vmatmul.mubr.f32.gmra.mrb[158].mxu1 %v1364_v7 }
 0x16e   : > { %v532_v20 = vpop.f32.mrb[38].mxu0 }
 0x16f   : > { %v758_v49 = vadd.f32 %v3978_v39, %v532_v20  ;;  %v534_v13 = vpop.f32.mrb[39].mxu0 }
 0x170   : > { %v942_v45 = vpop.f32.mrb[54].mxu1 }
 0x171   : > { %v4136_v28 = vadd.f32 %v942_v45, %v4080_v41  ;;  %v944_v46 = vpop.f32.mrb[55].mxu1 }
 0x172   : > { %v537_v50 = vpop.f32.mrb[40].mxu0 }
 0x173   : > { %v763_v32 = vadd.f32 %v3992_v56, %v537_v50  ;;  %v539_v52 = vpop.f32.mrb[41].mxu0 }
 0x174   : > { %v947_v19 = vpop.f32.mrb[56].mxu1 }
 0x175   : > { %v4140_v58 = vadd.f32 %v947_v19, %v4088_v33  ;;  %v949_v18 = vpop.f32.mrb[57].mxu1 }
 0x176   : > { %v542_v38 = vpop.f32.mrb[42].mxu0 }
 0x177   : > { %v768_v16 = vadd.f32 %v3989_v31, %v542_v38  ;;  %v544_v34 = vpop.f32.mrb[43].mxu0 }
 0x178   : > { %v952_v39 = vpop.f32.mrb[58].mxu1 }
 0x179   : > { %v4144_v35 = vadd.f32 %v952_v39, %v4096_v21  ;;  %v954_v41 = vpop.f32.mrb[59].mxu1 }
 0x17a   : > { %v547_v57 = vpop.f32.mrb[44].mxu0 }
 0x17b   : > { %v773_v22 = vadd.f32 %v4003_v43, %v547_v57  ;;  %v549_v6 = vpop.f32.mrb[45].mxu0 }
 0x17c   : > { %v957_v56 = vpop.f32.mrb[60].mxu1 }
 0x17d   : > { %v4148_v51 = vadd.f32 %v957_v56, %v4104_v25  ;;  %v959_v33 = vpop.f32.mrb[61].mxu1 }
 0x17e   : > { %v552_v4 = vpop.f32.mrb[46].mxu0 }
 0x17f   : > { %v778_v26 = vadd.f32 %v4000_v29, %v552_v4  ;;  %v554_v30 = vpop.f32.mrb[47].mxu0 }
 0x180   : > { %v962_v31 = vpop.f32.mrb[62].mxu1 }
 0x181   : > { %v4151_v55 = vadd.f32 %v962_v31, %v738_v23  ;;  %v964_v15 = vpop.f32.mrb[63].mxu1 }
 0x182   : > { %v557_v21 = vpop.f32.mrb[48].mxu0 }
 0x183   : > { %v783_v17 = vadd.f32 %v4014_v47, %v557_v21  ;;  %v559_v36 = vpop.f32.mrb[49].mxu0 }
 0x184   : > { %v967_v9 = vpop.f32.mrb[64].mxu1 }
 0x185   : > { %v4154_v43 = vadd.f32 %v967_v9, %v743_v59  ;;  %v969_v7 = vpop.f32.mrb[65].mxu1 }
 0x186   : > { %v562_v40 = vpop.f32.mrb[50].mxu0 }
 0x187   : > { %v788_v25 = vadd.f32 %v4011_v44, %v562_v40  ;;  %v564_v48 = vpop.f32.mrb[51].mxu0 }
 0x188   : > { %v972_v60 = vpop.f32.mrb[66].mxu1 }
 0x189   : > { %v4157_v20 = vadd.f32 %v972_v60, %v748_v54  ;;  %v974_v29 = vpop.f32.mrb[67].mxu1 }
 0x18a   : > { %v567_v13 = vpop.f32.mrb[52].mxu0 }
 0x18b   : > { %v793_v23 = vadd.f32 %v4025_v5, %v567_v13  ;;  %v569_v45 = vpop.f32.mrb[53].mxu0 }
 0x18c   : > { %v977_v46 = vpop.f32.mrb[68].mxu1 }
 0x18d   : > { %v4160_v50 = vadd.f32 %v977_v46, %v753_v2  ;;  %v979_v47 = vpop.f32.mrb[69].mxu1 }
 0x18e   : > { %v572_v52 = vpop.f32.mrb[54].mxu0 }
 0x18f   : > { %v798_v59 = vadd.f32 %v4022_v37, %v572_v52  ;;  %v574_v19 = vpop.f32.mrb[55].mxu0 }
 0x190   : > { %v982_v18 = vpop.f32.mrb[70].mxu1 }
 0x191   : > { %v4163_v38 = vadd.f32 %v982_v18, %v758_v49  ;;  %v984_v44 = vpop.f32.mrb[71].mxu1 }
 0x192   : > { %v577_v34 = vpop.f32.mrb[56].mxu0 }
 0x193   : > { %v803_v54 = vadd.f32 %v4036_v1, %v577_v34  ;;  %v579_v39 = vpop.f32.mrb[57].mxu0 }
 0x194   : > { %v987_v41 = vpop.f32.mrb[72].mxu1 }
 0x195   : > { %v4166_v57 = vadd.f32 %v987_v41, %v763_v32  ;;  %v989_v5 = vpop.f32.mrb[73].mxu1 }
 0x196   : > { %v582_v6 = vpop.f32.mrb[58].mxu0 }
 0x197   : > { %v808_v2 = vadd.f32 %v4033_v53, %v582_v6  ;;  %v584_v56 = vpop.f32.mrb[59].mxu0 }
 0x198   : > { %v992_v33 = vpop.f32.mrb[74].mxu1 }
 0x199   : > { %v4169_v4 = vadd.f32 %v992_v33, %v768_v16  ;;  %v994_v37 = vpop.f32.mrb[75].mxu1 }
 0x19a   : > { %v587_v30 = vpop.f32.mrb[60].mxu0 }
 0x19b   : > { %v813_v49 = vadd.f32 %v4047_v10, %v587_v30  ;;  %v589_v31 = vpop.f32.mrb[61].mxu0 }
 0x19c   : > { %v997_v15 = vpop.f32.mrb[76].mxu1 }
 0x19d   : > { %v4172_v21 = vadd.f32 %v997_v15, %v773_v22  ;;  %v999_v1 = vpop.f32.mrb[77].mxu1 }
 0x19e   : > { %v592_v36 = vpop.f32.mrb[62].mxu0 }
 0x19f   : > { %v818_v32 = vadd.f32 %v4044_v42, %v592_v36  ;;  %v594_v9 = vpop.f32.mrb[63].mxu0 }
 0x1a0   : > { %v1002_v7 = vpop.f32.mrb[78].mxu1 }
 0x1a1   : > { %v4175_v40 = vadd.f32 %v1002_v7, %v778_v26  ;;  %v1004_v53 = vpop.f32.mrb[79].mxu1 }
 0x1a2   : > { %v2518_v48 = vpop.f32.mrb[64].mxu0 }
 0x1a3   : > { %v4178_v16 = vadd.f32 %v2518_v48, %v4067_v0  ;;  %v1112_v60 = vpop.f32.mrb[65].mxu0 }
 0x1a4   : > { %v1007_v29 = vpop.f32.mrb[80].mxu1  ;;  %v4181_v10 = vadd.f32 %v1112_v60, %v4057_v11 }
 0x1a5   : > { %v4183_v22 = vadd.f32 %v1007_v29, %v783_v17  ;;  %v1009_v13 = vpop.f32.mrb[81].mxu1 }
 0x1a6   : > { %v2521_v45 = vpop.f32.mrb[66].mxu0 }
 0x1a7   : > { %v4186_v42 = vadd.f32 %v2521_v45, %v4083_v24  ;;  %v1122_v46 = vpop.f32.mrb[67].mxu0 }
 0x1a8   : > { %v1012_v26 = vpop.f32.mrb[82].mxu1  ;;  %v4189_v47 = vadd.f32 %v1122_v46, %v4075_v8 }
 0x1a9   : > { %v4191_v52 = vadd.f32 %v1012_v26, %v788_v25  ;;  %v1014_v0 = vpop.f32.mrb[83].mxu1 }
 0x1aa   : > { %v2524_v19 = vpop.f32.mrb[68].mxu0 }
 0x1ab   : > { %v4194_v18 = vadd.f32 %v2524_v19, %v4099_v12  ;;  %v1132_v11 = vpop.f32.mrb[69].mxu0 }
 0x1ac   : > { %v1017_v17 = vpop.f32.mrb[84].mxu1  ;;  %v4197_v44 = vadd.f32 %v1132_v11, %v4091_v3 }
 0x1ad   : > { %v4199_v34 = vadd.f32 %v1017_v17, %v793_v23  ;;  %v1019_v24 = vpop.f32.mrb[85].mxu1 }
 0x1ae   : > { %v2527_v39 = vpop.f32.mrb[70].mxu0 }
 0x1af   : > { %v4202_v41 = vadd.f32 %v2527_v39, %v4113_v63  ;;  %v1142_v8 = vpop.f32.mrb[71].mxu0 }
 0x1b0   : > { %v1022_v25 = vpop.f32.mrb[86].mxu1  ;;  %v4205_v5 = vadd.f32 %v1142_v8, %v4107_v62 }
 0x1b1   : > { %v1023_v6 = vadd.f32 %v1022_v25, %v798_v59  ;;  %v1024_v12 = vpop.f32.mrb[87].mxu1 }
 0x1b2   : > { %v2530_v56 = vpop.f32.mrb[72].mxu0 }
 0x1b3   : > { %v4208_v33 = vadd.f32 %v2530_v56, %v4127_v14  ;;  %v1152_v3 = vpop.f32.mrb[73].mxu0 }
 0x1b4   : > { %v1027_v37 = vpop.f32.mrb[88].mxu1  ;;  %v4211_v23 = vadd.f32 %v1152_v3, %v4120_v27 }
 0x1b5   : > { %v1028_v30 = vadd.f32 %v1027_v37, %v803_v54  ;;  %v1029_v31 = vpop.f32.mrb[89].mxu1 }
 0x1b6   : > { %v2533_v63 = vpop.f32.mrb[74].mxu0 }
 0x1b7   : > { %v4214_v15 = vadd.f32 %v2533_v63, %v4136_v28  ;;  %v1162_v1 = vpop.f32.mrb[75].mxu0 }
 0x1b8   : > { %v1032_v62 = vpop.f32.mrb[90].mxu1  ;;  %v4217_v59 = vadd.f32 %v1162_v1, %v4132_v61 }
 0x1b9   : > { %v1033_v36 = vadd.f32 %v1032_v62, %v808_v2  ;;  %v1034_v9 = vpop.f32.mrb[91].mxu1 }
 0x1ba   : > { %v2536_v14 = vpop.f32.mrb[76].mxu0 }
 0x1bb   : > { %v4220_v7 = vadd.f32 %v2536_v14, %v4144_v35  ;;  %v1172_v53 = vpop.f32.mrb[77].mxu0 }
 0x1bc   : > { %v1037_v27 = vpop.f32.mrb[92].mxu1  ;;  %v4223_v54 = vadd.f32 %v1172_v53, %v4140_v58 }
 0x1bd   : > { %v1038_v48 = vadd.f32 %v1037_v27, %v813_v49  ;;  %v1039_v60 = vpop.f32.mrb[93].mxu1 }
 0x1be   : > { %v2539_v28 = vpop.f32.mrb[78].mxu0 }
 0x1bf   : > { %v4226_v29 = vadd.f32 %v2539_v28, %v4151_v55  ;;  %v1182_v13 = vpop.f32.mrb[79].mxu0 }
 0x1c0   : > { %v1042_v61 = vpop.f32.mrb[94].mxu1  ;;  %v4229_v2 = vadd.f32 %v1182_v13, %v4148_v51 }
 0x1c1   : > { %v1043_v45 = vadd.f32 %v1042_v61, %v818_v32  ;;  %v1044_v46 = vpop.f32.mrb[95].mxu1 }
 0x1c2   : > { %v2542_v35 = vpop.f32.mrb[80].mxu0 }
 0x1c3   : > { %v4232_v26 = vadd.f32 %v2542_v35, %v4157_v20  ;;  %v1192_v0 = vpop.f32.mrb[81].mxu0 }
 0x1c4   : > { %v4235_v58 = vadd.f32 %v1192_v0, %v4154_v43  ;;  %v1482_v49 = vpop.f32.mrb[96].mxu1 }
 0x1c5   : > { %v1484_v19 = vpop.f32.mrb[97].mxu1 }
 0x1c6   : > { %v2545_v11 = vpop.f32.mrb[82].mxu0 }
 0x1c7   : > { %v4238_v55 = vadd.f32 %v2545_v11, %v4163_v38  ;;  %v1202_v17 = vpop.f32.mrb[83].mxu0 }
 0x1c8   : > { %v4241_v51 = vadd.f32 %v1202_v17, %v4160_v50  ;;  %v1487_v32 = vpop.f32.mrb[98].mxu1 }
 0x1c9   : > { %v1489_v24 = vpop.f32.mrb[99].mxu1 }
 0x1ca   : > { %v2548_v39 = vpop.f32.mrb[84].mxu0 }
 0x1cb   : > { %v4244_v20 = vadd.f32 %v2548_v39, %v4169_v4  ;;  %v1212_v8 = vpop.f32.mrb[85].mxu0 }
 0x1cc   : > { %v4247_v43 = vadd.f32 %v1212_v8, %v4166_v57  ;;  %v1492_v25 = vpop.f32.mrb[100].mxu1 }
 0x1cd   : > { %v1494_v12 = vpop.f32.mrb[101].mxu1 }
 0x1ce   : > { %v2551_v56 = vpop.f32.mrb[86].mxu0 }
 0x1cf   : > { %v4250_v38 = vadd.f32 %v2551_v56, %v4175_v40  ;;  %v1222_v3 = vpop.f32.mrb[87].mxu0 }
 0x1d0   : > { %v4253_v50 = vadd.f32 %v1222_v3, %v4172_v21  ;;  %v1497_v37 = vpop.f32.mrb[102].mxu1 }
 0x1d1   : > { %v1499_v31 = vpop.f32.mrb[103].mxu1 }
 0x1d2   : > { %v2554_v63 = vpop.f32.mrb[88].mxu0 }
 0x1d3   : > { %v4256_v4 = vadd.f32 %v2554_v63, %v4191_v52  ;;  %v1232_v1 = vpop.f32.mrb[89].mxu0 }
 0x1d4   : > { %v4259_v57 = vadd.f32 %v1232_v1, %v4183_v22  ;;  %v1502_v62 = vpop.f32.mrb[104].mxu1 }
 0x1d5   : > { %v1504_v9 = vpop.f32.mrb[105].mxu1 }
 0x1d6   : > { %v2557_v14 = vpop.f32.mrb[90].mxu0 }
 0x1d7   : > { %v4261_v53 = vadd.f32 %v2557_v14, %v1023_v6  ;;  %v1242_v40 = vpop.f32.mrb[91].mxu0 }
 0x1d8   : > { %v4264_v27 = vadd.f32 %v1242_v40, %v4199_v34  ;;  %v1507_v21 = vpop.f32.mrb[106].mxu1 }
 0x1d9   : > { %v1509_v60 = vpop.f32.mrb[107].mxu1 }
 0x1da   : > { %v2560_v28 = vpop.f32.mrb[92].mxu0 }
 0x1db   : > { %v4266_v13 = vadd.f32 %v2560_v28, %v1033_v36  ;;  %v1252_v52 = vpop.f32.mrb[93].mxu0  ;;  %v4277_v36 = vld [vmem:[%s4439_s2] ss:$0 sm:$0xff] }
 0x1dc   : > { %v4268_v61 = vadd.f32 %v1252_v52, %v1028_v30  ;;  %v1512_v46 = vpop.f32.mrb[108].mxu1 }
 0x1dd   : > { %v1514_v22 = vpop.f32.mrb[109].mxu1 }
 0x1de   : > { %v2563_v35 = vpop.f32.mrb[94].mxu0 }
 0x1df   : > { %v4270_v0 = vadd.f32 %v2563_v35, %v1043_v45  ;;  %v1262_v19 = vpop.f32.mrb[95].mxu0 }
 0x1e0   : > { %v4272_v6 = vadd.f32 %v1262_v19, %v1038_v48  ;;  %v1517_v11 = vpop.f32.mrb[110].mxu1 }
 0x1e1   : > { %v1519_v17 = vpop.f32.mrb[111].mxu1 }
 0x1e2   : > { %v2598_v34 = vpop.f32.mrb[96].mxu0 }
 0x1e3   : > { %v1713_v24 = vadd.f32 %v2598_v34, %v1487_v32  ;;  %v1707_v39 = vpop.f32.mrb[97].mxu0 }
 0x1e4   : > { %v4279_v30 = vpop.f32.mrb[112].mxu1  ;;  %v1708_v8 = vadd.f32 %v1707_v39, %v1482_v49 }
 0x1e5   : > { %v1867_v12 = vadd.f32 %v1713_v24, %v4178_v16  ;;  %v1524_v45 = vpop.f32.mrb[113].mxu1 }
 0x1e6   : > { %v1866_v48 = vadd.f32 %v1708_v8, %v4181_v10  ;;  %v2601_v56 = vpop.f32.mrb[98].mxu0 }
 0x1e7   : > { %v1905_v3 = vadd.f32 %v4277_v36, %v1867_v12  ;;  %v1723_v31 = vadd.f32 %v2601_v56, %v1497_v37  ;;  %v1717_v32 = vpop.f32.mrb[99].mxu0 }
 0x1e8   : > { %v1904_v63 = vadd.f32 %v4277_v36, %v1866_v48  ;;  %v1527_v1 = vpop.f32.mrb[114].mxu1  ;;  %v1718_v9 = vadd.f32 %v1717_v32, %v1492_v25 }
 0x1e9   : > { %v1937_v14 = vadd.f32 3.0, %v1905_v3  ;;  %v1869_v40 = vadd.f32 %v1723_v31, %v4186_v42  ;;  %v1529_v60 = vpop.f32.mrb[115].mxu1 }
 0x1ea   : > { %v1936_v49 = vadd.f32 3.0, %v1904_v63  ;;  %v1868_v16 = vadd.f32 %v1718_v9, %v4189_v47  ;;  %v2604_v28 = vpop.f32.mrb[100].mxu0 }
 0x1eb   : > { %v1969_v52 = vmax.f32 %v1937_v14, 0.0  ;;  %v1907_v10 = vadd.f32 %v4277_v36, %v1869_v40  ;;  %v1733_v22 = vadd.f32 %v2604_v28, %v1507_v21  ;;  %v1727_v35 = vpop.f32.mrb[101].mxu0 }
 0x1ec   : > { %v1968_v37 = vmax.f32 %v1936_v49, 0.0  ;;  %v1906_v19 = vadd.f32 %v4277_v36, %v1868_v16  ;;  %v1532_v17 = vpop.f32.mrb[116].mxu1  ;;  %v1728_v34 = vadd.f32 %v1727_v35, %v1502_v62 }
 0x1ed   : > { %v2001_v25 = vmin.f32 %v1969_v52, 6.0  ;;  %v1939_v24 = vadd.f32 3.0, %v1907_v10  ;;  %v1871_v42 = vadd.f32 %v1733_v22, %v4194_v18  ;;  %v1534_v39 = vpop.f32.mrb[117].mxu1 }
 0x1ee   : > { %v2000_v47 = vmin.f32 %v1968_v37, 6.0  ;;  %v1938_v21 = vadd.f32 3.0, %v1906_v19  ;;  %v1870_v8 = vadd.f32 %v1728_v34, %v4197_v44  ;;  %v2607_v12 = vpop.f32.mrb[102].mxu0 }
 0x1ef   : > { %v2033_v45 = vmul.f32 0.16666667, %v2001_v25  ;;  %v1971_v62 = vmax.f32 %v1939_v24, 0.0  ;;  %v1909_v48 = vadd.f32 %v4277_v36, %v1871_v42  ;;  %v1743_v56 = vadd.f32 %v2607_v12, %v1517_v11  ;;  %v1737_v18 = vpop.f32.mrb[103].mxu0 }
 0x1f0   : > { %v2032_v3 = vmul.f32 0.16666667, %v2000_v47  ;;  %v1970_v31 = vmax.f32 %v1938_v21, 0.0  ;;  %v1908_v32 = vadd.f32 %v4277_v36, %v1870_v8  ;;  %v1537_v63 = vpop.f32.mrb[118].mxu1  ;;  %v1738_v9 = vadd.f32 %v1737_v18, %v1512_v46 }
 0x1f1   : > { %2066 = vst.msk [vmem:[%s4294_s21 + $0x8] sm:$0xff] %vm2064_vm0, %v2033_v45  ;;  %v2003_v14 = vmin.f32 %v1971_v62, 6.0  ;;  %v1941_v40 = vadd.f32 3.0, %v1909_v48  ;;  %v1873_v44 = vadd.f32 %v1743_v56, %v4202_v41  ;;  %v1539_v60 = vpop.f32.mrb[119].mxu1 }
 0x1f2   : > { %2065 = vst.msk [vmem:[%s4294_s21] sm:$0xff] %vm2064_vm0, %v2032_v3  ;;  %v2002_v49 = vmin.f32 %v1970_v31, 6.0  ;;  %v1940_v16 = vadd.f32 3.0, %v1908_v32  ;;  %v1872_v11 = vadd.f32 %v1738_v9, %v4205_v5  ;;  %v2610_v28 = vpop.f32.mrb[104].mxu0 }
 0x1f3   : > { %v2035_v52 = vmul.f32 0.16666667, %v2003_v14  ;;  %v1973_v10 = vmax.f32 %v1941_v40, 0.0  ;;  %v1911_v46 = vadd.f32 %v4277_v36, %v1873_v44  ;;  %v1753_v22 = vadd.f32 %v2610_v28, %v1527_v1  ;;  %v1747_v35 = vpop.f32.mrb[105].mxu0 }
 0x1f4   : > { %v2034_v37 = vmul.f32 0.16666667, %v2002_v49  ;;  %v1972_v19 = vmax.f32 %v1940_v16, 0.0  ;;  %v1910_v41 = vadd.f32 %v4277_v36, %v1872_v11  ;;  %v1542_v34 = vpop.f32.mrb[120].mxu1  ;;  %v1748_v25 = vadd.f32 %v1747_v35, %v4279_v30 }
 0x1f5   : > { %2068 = vst.msk [vmem:[%s4294_s21 + $0x18] sm:$0xff] %vm2064_vm0, %v2035_v52  ;;  %v2005_v24 = vmin.f32 %v1973_v10, 6.0  ;;  %v1943_v42 = vadd.f32 3.0, %v1911_v46  ;;  %v1875_v5 = vadd.f32 %v1753_v22, %v4208_v33  ;;  %v1544_v39 = vpop.f32.mrb[121].mxu1 }
 0x1f6   : > { %2067 = vst.msk [vmem:[%s4294_s21 + $0x10] sm:$0xff] %vm2064_vm0, %v2034_v37  ;;  %v2004_v47 = vmin.f32 %v1972_v19, 6.0  ;;  %v1942_v1 = vadd.f32 3.0, %v1910_v41  ;;  %v1874_v21 = vadd.f32 %v1748_v25, %v4211_v23  ;;  %v2613_v8 = vpop.f32.mrb[106].mxu0 }
 0x1f7   : > { %v2037_v12 = vmul.f32 0.16666667, %v2005_v24  ;;  %v1975_v45 = vmax.f32 %v1943_v42, 0.0  ;;  %v1913_v30 = vadd.f32 %v4277_v36, %v1875_v5  ;;  %v1763_v62 = vadd.f32 %v2613_v8, %v1537_v63  ;;  %v1757_v48 = vpop.f32.mrb[107].mxu0 }
 0x1f8   : > { %v2036_v56 = vmul.f32 0.16666667, %v2004_v47  ;;  %v1974_v18 = vmax.f32 %v1942_v1, 0.0  ;;  %v1912_v33 = vadd.f32 %v4277_v36, %v1874_v21  ;;  %v1547_v3 = vpop.f32.mrb[122].mxu1  ;;  %v1758_v31 = vadd.f32 %v1757_v48, %v1532_v17 }
 0x1f9   : > { %2070 = vst.msk [vmem:[%s4294_s21 + $0x28] sm:$0xff] %vm2064_vm0, %v2037_v12  ;;  %v2007_v32 = vmin.f32 %v1975_v45, 6.0  ;;  %v1945_v9 = vadd.f32 3.0, %v1913_v30  ;;  %v1877_v23 = vadd.f32 %v1763_v62, %v4214_v15  ;;  %v1549_v14 = vpop.f32.mrb[123].mxu1 }
 0x1fa   : > { %2069 = vst.msk [vmem:[%s4294_s21 + $0x20] sm:$0xff] %vm2064_vm0, %v2036_v56  ;;  %v2006_v40 = vmin.f32 %v1974_v18, 6.0  ;;  %v1944_v44 = vadd.f32 3.0, %v1912_v33  ;;  %v1876_v63 = vadd.f32 %v1758_v31, %v4217_v59  ;;  %v2616_v60 = vpop.f32.mrb[108].mxu0 }
 0x1fb   : > { %v2039_v49 = vmul.f32 0.16666667, %v2007_v32  ;;  %v1977_v16 = vmax.f32 %v1945_v9, 0.0  ;;  %v1915_v17 = vadd.f32 %v4277_v36, %v1877_v23  ;;  %v1773_v11 = vadd.f32 %v2616_v60, %v1547_v3  ;;  %v1767_v28 = vpop.f32.mrb[109].mxu0 }
 0x1fc   : > { %v2038_v52 = vmul.f32 0.16666667, %v2006_v40  ;;  %v1976_v10 = vmax.f32 %v1944_v44, 0.0  ;;  %v1914_v15 = vadd.f32 %v4277_v36, %v1876_v63  ;;  %v1552_v46 = vpop.f32.mrb[124].mxu1  ;;  %v1768_v22 = vadd.f32 %v1767_v28, %v1542_v34 }
 0x1fd   : > { %2072 = vst.msk [vmem:[%s4294_s21 + $0x38] sm:$0xff] %vm2064_vm0, %v2039_v49  ;;  %v2009_v35 = vmin.f32 %v1977_v16, 6.0  ;;  %v1947_v37 = vadd.f32 3.0, %v1915_v17  ;;  %v1879_v59 = vadd.f32 %v1773_v11, %v4220_v7  ;;  %v1554_v19 = vpop.f32.mrb[125].mxu1 }
 0x1fe   : > { %2071 = vst.msk [vmem:[%s4294_s21 + $0x30] sm:$0xff] %vm2064_vm0, %v2038_v52  ;;  %v2008_v41 = vmin.f32 %v1976_v10, 6.0  ;;  %v1946_v25 = vadd.f32 3.0, %v1914_v15  ;;  %v1878_v24 = vadd.f32 %v1768_v22, %v4223_v54  ;;  %v2619_v42 = vpop.f32.mrb[110].mxu0 }
 0x1ff   : > { %v2041_v5 = vmul.f32 0.16666667, %v2009_v35  ;;  %v1979_v39 = vmax.f32 %v1947_v37, 0.0  ;;  %v1917_v34 = vadd.f32 %v4277_v36, %v1879_v59  ;;  %v1777_v47 = vpop.f32.mrb[111].mxu0 }
 0x200   : > { %v2040_v1 = vmul.f32 0.16666667, %v2008_v41  ;;  %v1978_v21 = vmax.f32 %v1946_v25, 0.0  ;;  %v1916_v8 = vadd.f32 %v4277_v36, %v1878_v24  ;;  %v1557_v7 = vpop.f32.mrb[126].mxu1  ;;  %v1778_v12 = vadd.f32 %v1777_v47, %v1552_v46 }
 0x201   : > { %2074 = vst.msk [vmem:[%s4294_s21 + $0x48] sm:$0xff] %vm2064_vm0, %v2041_v5  ;;  %v2011_v45 = vmin.f32 %v1979_v39, 6.0  ;;  %v1949_v30 = vadd.f32 3.0, %v1917_v34  ;;  %v1783_v62 = vadd.f32 %v2619_v42, %v1557_v7  ;;  %v1559_v54 = vpop.f32.mrb[127].mxu1 }
 0x202   : > { %2073 = vst.msk [vmem:[%s4294_s21 + $0x40] sm:$0xff] %vm2064_vm0, %v2040_v1  ;;  %v2010_v48 = vmin.f32 %v1978_v21, 6.0  ;;  %v1948_v56 = vadd.f32 3.0, %v1916_v8  ;;  %v1880_v18 = vadd.f32 %v1778_v12, %v4229_v2  ;;  %v2622_v33 = vpop.f32.mrb[112].mxu0 }
 0x203   : > { %v2043_v3 = vmul.f32 0.16666667, %v2011_v45  ;;  %v1981_v31 = vmax.f32 %v1949_v30, 0.0  ;;  %v1881_v32 = vadd.f32 %v1783_v62, %v4226_v29  ;;  %v1787_v9 = vpop.f32.mrb[113].mxu0 }
 0x204   : > { %v2042_v23 = vmul.f32 0.16666667, %v2010_v48  ;;  %v1980_v14 = vmax.f32 %v1948_v56, 0.0  ;;  %v1918_v40 = vadd.f32 %v4277_v36, %v1880_v18  ;;  %v1562_v44 = vpop.f32.mrb[128].mxu1 }
 0x205   : > { %2076 = vst.msk [vmem:[%s4294_s21 + $0x58] sm:$0xff] %vm2064_vm0, %v2043_v3  ;;  %v2013_v63 = vmin.f32 %v1981_v31, 6.0  ;;  %v1919_v60 = vadd.f32 %v4277_v36, %v1881_v32  ;;  %v1788_v49 = vadd.f32 %v1787_v9, %v1562_v44  ;;  %v1564_v16 = vpop.f32.mrb[129].mxu1 }
 0x206   : > { %2075 = vst.msk [vmem:[%s4294_s21 + $0x50] sm:$0xff] %vm2064_vm0, %v2042_v23  ;;  %v2012_v2 = vmin.f32 %v1980_v14, 6.0  ;;  %v1950_v17 = vadd.f32 3.0, %v1918_v40  ;;  %v2625_v29 = vpop.f32.mrb[114].mxu0 }
 0x207   : > { %v2045_v11 = vmul.f32 0.16666667, %v2013_v63  ;;  %v1951_v28 = vadd.f32 3.0, %v1919_v60  ;;  %v1882_v52 = vadd.f32 %v1788_v49, %v4235_v58  ;;  %v1797_v10 = vpop.f32.mrb[115].mxu0 }
 0x208   : > { %v2044_v15 = vmul.f32 0.16666667, %v2012_v2  ;;  %v1982_v46 = vmax.f32 %v1950_v17, 0.0  ;;  %v1567_v22 = vpop.f32.mrb[130].mxu1 }
 0x209   : > { %2078 = vst.msk [vmem:[%s4294_s21 + $0x68] sm:$0xff] %vm2064_vm0, %v2045_v11  ;;  %v1983_v35 = vmax.f32 %v1951_v28, 0.0  ;;  %v1920_v37 = vadd.f32 %v4277_v36, %v1882_v52  ;;  %v1793_v59 = vadd.f32 %v2622_v33, %v1567_v22  ;;  %v1569_v19 = vpop.f32.mrb[131].mxu1 }
 0x20a   : > { %2077 = vst.msk [vmem:[%s4294_s21 + $0x60] sm:$0xff] %vm2064_vm0, %v2044_v15  ;;  %v2014_v41 = vmin.f32 %v1982_v46, 6.0  ;;  %v2628_v25 = vpop.f32.mrb[116].mxu0 }
 0x20b   : > { %v2015_v24 = vmin.f32 %v1983_v35, 6.0  ;;  %v1952_v42 = vadd.f32 3.0, %v1920_v37  ;;  %v1883_v58 = vadd.f32 %v1793_v59, %v4232_v26  ;;  %v1807_v5 = vpop.f32.mrb[117].mxu0 }
 0x20c   : > { %v2046_v39 = vmul.f32 0.16666667, %v2014_v41  ;;  %v1572_v34 = vpop.f32.mrb[132].mxu1 }
 0x20d   : > { %v2047_v47 = vmul.f32 0.16666667, %v2015_v24  ;;  %v1984_v1 = vmax.f32 %v1952_v42, 0.0  ;;  %v1921_v21 = vadd.f32 %v4277_v36, %v1883_v58  ;;  %v1798_v8 = vadd.f32 %v1797_v10, %v1572_v34  ;;  %v1574_v7 = vpop.f32.mrb[133].mxu1 }
 0x20e   : > { %2079 = vst.msk [vmem:[%s4294_s21 + $0x70] sm:$0xff] %vm2064_vm0, %v2046_v39  ;;  %v2631_v12 = vpop.f32.mrb[118].mxu0 }
 0x20f   : > { %2080 = vst.msk [vmem:[%s4294_s21 + $0x78] sm:$0xff] %vm2064_vm0, %v2047_v47  ;;  %v2016_v45 = vmin.f32 %v1984_v1, 6.0  ;;  %v1953_v30 = vadd.f32 3.0, %v1921_v21  ;;  %v1884_v62 = vadd.f32 %v1798_v8, %v4241_v51  ;;  %v1817_v26 = vpop.f32.mrb[119].mxu0 }
 0x210   : > { %v1577_v54 = vpop.f32.mrb[134].mxu1 }
 0x211   : > { %v2048_v48 = vmul.f32 0.16666667, %v2016_v45  ;;  %v1985_v56 = vmax.f32 %v1953_v30, 0.0  ;;  %v1922_v18 = vadd.f32 %v4277_v36, %v1884_v62  ;;  %v1803_v33 = vadd.f32 %v2625_v29, %v1577_v54  ;;  %v1579_v3 = vpop.f32.mrb[135].mxu1 }
 0x212   : > { %v4358_v31 = vpop.f32.mrb[120].mxu0 }
 0x213   : > { %2081 = vst.msk [vmem:[%s4294_s21 + $0x80] sm:$0xff] %vm2064_vm0, %v2048_v48  ;;  %v2017_v32 = vmin.f32 %v1985_v56, 6.0  ;;  %v1954_v9 = vadd.f32 3.0, %v1922_v18  ;;  %v1885_v23 = vadd.f32 %v1803_v33, %v4238_v55  ;;  %v1827_v14 = vpop.f32.mrb[121].mxu0 }
 0x214   : > { %v1582_v40 = vpop.f32.mrb[136].mxu1 }
 0x215   : > { %v2049_v51 = vmul.f32 0.16666667, %v2017_v32  ;;  %v1986_v44 = vmax.f32 %v1954_v9, 0.0  ;;  %v1923_v63 = vadd.f32 %v4277_v36, %v1885_v23  ;;  %v1808_v60 = vadd.f32 %v1807_v5, %v1582_v40  ;;  %v1584_v49 = vpop.f32.mrb[137].mxu1 }
 0x216   : > { %v4364_v16 = vpop.f32.mrb[122].mxu0 }
 0x217   : > { %2082 = vst.msk [vmem:[%s4294_s21 + $0x88] sm:$0xff] %vm2064_vm0, %v2049_v51  ;;  %v2018_v2 = vmin.f32 %v1986_v44, 6.0  ;;  %v1955_v17 = vadd.f32 3.0, %v1923_v63  ;;  %v1886_v29 = vadd.f32 %v1808_v60, %v4247_v43  ;;  %v1837_v11 = vpop.f32.mrb[123].mxu0 }
 0x218   : > { %v1587_v28 = vpop.f32.mrb[138].mxu1 }
 0x219   : > { %v2050_v55 = vmul.f32 0.16666667, %v2018_v2  ;;  %v1987_v52 = vmax.f32 %v1955_v17, 0.0  ;;  %v1924_v10 = vadd.f32 %v4277_v36, %v1886_v29  ;;  %v1813_v15 = vadd.f32 %v2628_v25, %v1587_v28  ;;  %v1589_v46 = vpop.f32.mrb[139].mxu1 }
 0x21a   : > { %v4370_v22 = vpop.f32.mrb[124].mxu0 }
 0x21b   : > { %2083 = vst.msk [vmem:[%s4294_s21 + $0x90] sm:$0xff] %vm2064_vm0, %v2050_v55  ;;  %v2019_v35 = vmin.f32 %v1987_v52, 6.0  ;;  %v1956_v37 = vadd.f32 3.0, %v1924_v10  ;;  %v1887_v59 = vadd.f32 %v1813_v15, %v4244_v20  ;;  %v4375_v19 = vpop.f32.mrb[125].mxu0 }
 0x21c   : > { %v1592_v43 = vpop.f32.mrb[140].mxu1 }
 0x21d   : > { %v2051_v41 = vmul.f32 0.16666667, %v2019_v35  ;;  %v1988_v24 = vmax.f32 %v1956_v37, 0.0  ;;  %v1925_v42 = vadd.f32 %v4277_v36, %v1887_v59  ;;  %v1818_v58 = vadd.f32 %v1817_v26, %v1592_v43  ;;  %v1594_v5 = vpop.f32.mrb[141].mxu1 }
 0x21e   : > { %v4378_v25 = vpop.f32.mrb[126].mxu0 }
 0x21f   : > { %2084 = vst.msk [vmem:[%s4294_s21 + $0x98] sm:$0xff] %vm2064_vm0, %v2051_v41  ;;  %v2020_v39 = vmin.f32 %v1988_v24, 6.0  ;;  %v1957_v34 = vadd.f32 3.0, %v1925_v42  ;;  %v1888_v47 = vadd.f32 %v1818_v58, %v4253_v50  ;;  %v4383_v1 = vpop.f32.mrb[127].mxu0 }
 0x220   : > { %v1597_v20 = vpop.f32.mrb[142].mxu1 }
 0x221   : > { %v2052_v21 = vmul.f32 0.16666667, %v2020_v39  ;;  %v1989_v8 = vmax.f32 %v1957_v34, 0.0  ;;  %v1926_v7 = vadd.f32 %v4277_v36, %v1888_v47  ;;  %v1823_v45 = vadd.f32 %v2631_v12, %v1597_v20  ;;  %v1599_v30 = vpop.f32.mrb[143].mxu1 }
 0x223   : > { %2085 = vst.msk [vmem:[%s4294_s21 + $0xa0] sm:$0xff] %vm2064_vm0, %v2052_v21  ;;  %v2021_v62 = vmin.f32 %v1989_v8, 6.0  ;;  %v1958_v26 = vadd.f32 3.0, %v1926_v7  ;;  %v1889_v54 = vadd.f32 %v1823_v45, %v4250_v38 }
 0x224   : > { %v1602_v48 = vpop.f32.mrb[144].mxu1 }
 0x225   : > { %v2053_v56 = vmul.f32 0.16666667, %v2021_v62  ;;  %v1990_v50 = vmax.f32 %v1958_v26, 0.0  ;;  %v1927_v18 = vadd.f32 %v4277_v36, %v1889_v54  ;;  %v1828_v33 = vadd.f32 %v1827_v14, %v1602_v48  ;;  %v1604_v3 = vpop.f32.mrb[145].mxu1 }
 0x227   : > { %2086 = vst.msk [vmem:[%s4294_s21 + $0xa8] sm:$0xff] %vm2064_vm0, %v2053_v56  ;;  %v2022_v32 = vmin.f32 %v1990_v50, 6.0  ;;  %v1959_v9 = vadd.f32 3.0, %v1927_v18  ;;  %v1890_v12 = vadd.f32 %v1828_v33, %v4259_v57 }
 0x228   : > { %v1607_v23 = vpop.f32.mrb[146].mxu1 }
 0x229   : > { %v2054_v40 = vmul.f32 0.16666667, %v2022_v32  ;;  %v1991_v51 = vmax.f32 %v1959_v9, 0.0  ;;  %v1928_v38 = vadd.f32 %v4277_v36, %v1890_v12  ;;  %v1833_v44 = vadd.f32 %v4358_v31, %v1607_v23  ;;  %v1609_v63 = vpop.f32.mrb[147].mxu1 }
 0x22b   : > { %2087 = vst.msk [vmem:[%s4294_s21 + $0xb0] sm:$0xff] %vm2064_vm0, %v2054_v40  ;;  %v2023_v60 = vmin.f32 %v1991_v51, 6.0  ;;  %v1960_v14 = vadd.f32 3.0, %v1928_v38  ;;  %v1891_v49 = vadd.f32 %v1833_v44, %v4256_v4 }
 0x22c   : > { %v1612_v2 = vpop.f32.mrb[148].mxu1 }
 0x22d   : > { %v2055_v17 = vmul.f32 0.16666667, %v2023_v60  ;;  %v1992_v29 = vmax.f32 %v1960_v14, 0.0  ;;  %v1929_v57 = vadd.f32 %v4277_v36, %v1891_v49  ;;  %v1838_v28 = vadd.f32 %v1837_v11, %v1612_v2  ;;  %v1614_v55 = vpop.f32.mrb[149].mxu1 }
 0x22f   : > { %2088 = vst.msk [vmem:[%s4294_s21 + $0xb8] sm:$0xff] %vm2064_vm0, %v2055_v17  ;;  %v2024_v52 = vmin.f32 %v1992_v29, 6.0  ;;  %v1961_v10 = vadd.f32 3.0, %v1929_v57  ;;  %v1892_v31 = vadd.f32 %v1838_v28, %v4264_v27 }
 0x230   : > { %v1617_v15 = vpop.f32.mrb[150].mxu1 }
 0x231   : > { %v2056_v46 = vmul.f32 0.16666667, %v2024_v52  ;;  %v1993_v35 = vmax.f32 %v1961_v10, 0.0  ;;  %v1930_v4 = vadd.f32 %v4277_v36, %v1892_v31  ;;  %v1843_v37 = vadd.f32 %v4364_v16, %v1617_v15  ;;  %v1619_v59 = vpop.f32.mrb[151].mxu1 }
 0x233   : > { %2089 = vst.msk [vmem:[%s4294_s21 + $0xc0] sm:$0xff] %vm2064_vm0, %v2056_v46  ;;  %v2025_v43 = vmin.f32 %v1993_v35, 6.0  ;;  %v1962_v11 = vadd.f32 3.0, %v1930_v4  ;;  %v1893_v41 = vadd.f32 %v1843_v37, %v4261_v53 }
 0x234   : > { %v1622_v24 = vpop.f32.mrb[152].mxu1 }
 0x235   : > { %v2057_v42 = vmul.f32 0.16666667, %v2025_v43  ;;  %v1994_v58 = vmax.f32 %v1962_v11, 0.0  ;;  %v1931_v27 = vadd.f32 %v4277_v36, %v1893_v41  ;;  %v1848_v5 = vadd.f32 %v4375_v19, %v1622_v24  ;;  %v1624_v39 = vpop.f32.mrb[153].mxu1 }
 0x237   : > { %2090 = vst.msk [vmem:[%s4294_s21 + $0xc8] sm:$0xff] %vm2064_vm0, %v2057_v42  ;;  %v2026_v34 = vmin.f32 %v1994_v58, 6.0  ;;  %v1963_v16 = vadd.f32 3.0, %v1931_v27  ;;  %v1894_v47 = vadd.f32 %v1848_v5, %v4268_v61 }
 0x238   : > { %v1627_v20 = vpop.f32.mrb[154].mxu1 }
 0x239   : > { %v2058_v21 = vmul.f32 0.16666667, %v2026_v34  ;;  %v1995_v8 = vmax.f32 %v1963_v16, 0.0  ;;  %v1932_v53 = vadd.f32 %v4277_v36, %v1894_v47  ;;  %v1853_v7 = vadd.f32 %v4370_v22, %v1627_v20  ;;  %v1629_v45 = vpop.f32.mrb[155].mxu1 }
 0x23b   : > { %2091 = vst.msk [vmem:[%s4294_s21 + $0xd0] sm:$0xff] %vm2064_vm0, %v2058_v21  ;;  %v2027_v30 = vmin.f32 %v1995_v8, 6.0  ;;  %v1964_v19 = vadd.f32 3.0, %v1932_v53  ;;  %v1895_v62 = vadd.f32 %v1853_v7, %v4266_v13 }
 0x23c   : > { %v1632_v26 = vpop.f32.mrb[156].mxu1 }
 0x23d   : > { %v2059_v54 = vmul.f32 0.16666667, %v2027_v30  ;;  %v1996_v48 = vmax.f32 %v1964_v19, 0.0  ;;  %v1933_v61 = vadd.f32 %v4277_v36, %v1895_v62  ;;  %v1858_v56 = vadd.f32 %v4383_v1, %v1632_v26  ;;  %v1634_v50 = vpop.f32.mrb[157].mxu1 }
 0x23f   : > { %2092 = vst.msk [vmem:[%s4294_s21 + $0xd8] sm:$0xff] %vm2064_vm0, %v2059_v54  ;;  %v2028_v18 = vmin.f32 %v1996_v48, 6.0  ;;  %v1965_v22 = vadd.f32 3.0, %v1933_v61  ;;  %v1896_v33 = vadd.f32 %v1858_v56, %v4272_v6 }
 0x240   : > { %v1637_v3 = vpop.f32.mrb[158].mxu1 }
 0x241   : > { %v2060_v32 = vmul.f32 0.16666667, %v2028_v18  ;;  %v1997_v9 = vmax.f32 %v1965_v22, 0.0  ;;  %v1934_v13 = vadd.f32 %v4277_v36, %v1896_v33  ;;  %v1863_v12 = vadd.f32 %v4378_v25, %v1637_v3  ;;  %v1639_v23 = vpop.f32.mrb[159].mxu1 }
 0x243   : > { %2093 = vst.msk [vmem:[%s4294_s21 + $0xe0] sm:$0xff] %vm2064_vm0, %v2060_v32  ;;  %v2029_v1 = vmin.f32 %v1997_v9, 6.0  ;;  %v1966_v40 = vadd.f32 3.0, %v1934_v13  ;;  %v1897_v51 = vadd.f32 %v1863_v12, %v4270_v0 }
 0x245   : > { %v2061_v38 = vmul.f32 0.16666667, %v2029_v1  ;;  %v1998_v44 = vmax.f32 %v1966_v40, 0.0  ;;  %v1935_v6 = vadd.f32 %v4277_v36, %v1897_v51 }
 0x247   : > { %2094 = vst.msk [vmem:[%s4294_s21 + $0xe8] sm:$0xff] %vm2064_vm0, %v2061_v38  ;;  %v2030_v63 = vmin.f32 %v1998_v44, 6.0  ;;  %v1967_v60 = vadd.f32 3.0, %v1935_v6 }
 0x249   : > { %v2062_v14 = vmul.f32 0.16666667, %v2030_v63  ;;  %v1999_v49 = vmax.f32 %v1967_v60, 0.0 }
 0x24b   : > { %2095 = vst.msk [vmem:[%s4294_s21 + $0xf0] sm:$0xff] %vm2064_vm0, %v2062_v14  ;;  %v2031_v25 = vmin.f32 %v1999_v49, 6.0 }
 0x24d   : > { %v2063_v2 = vmul.f32 0.16666667, %v2031_v25 }
 0x24f   : > { %2096 = vst.msk [vmem:[%s4294_s21 + $0xf8] sm:$0xff] %vm2064_vm0, %v2063_v2 }
 0x250 PF: > { %s13_s12 = sadd.s32 1, %s2901_s12  }
 0x251   : > { %p10_p4 = scmp.ge.s32.totalorder %s13_s12, 4  }
 0x253   :  { %12 = sbr.rel (!%p10_p4) target bundleno = 1 (0x1), region = 64 }

</bundles_post_ra>
